<compile_context>
chip_gen: v7x
topology: tpu7x:2x2x1
jax: 0.10.0
libtpu: 0.0.40
codegen_flags: <defaults>
</compile_context>

<pallas_src>
import functools
import math

import jax
import jax.numpy as jnp
from jax.experimental import pallas as pl
from jax.experimental.pallas import tpu as pltpu

LN_EPS = 1e-5        # PyTorch nn.LayerNorm default
NEG_MASK = -1e30     # finite "minus infinity"

PACKED_ORDER = (
    "wqkv", "bqkv", "wo", "bo",
    "w1", "b1", "w2", "b2",
    "ln1w", "ln1b", "ln2w", "ln2b", "fnw", "fnb",
)


def _round_up(x, m):
    return ((x + m - 1) // m) * m


def sasrec_kernel(
    x_ref,            # (Bt, Sp, Ep)   activations for this batch tile (f32)
    padmask_ref,      # (Bt, 1, Sp)    additive f32 key-padding mask (0 / NEG_MASK)
    wqkv_ref,         # (L, Ep, 3Ep)   bf16 fused QKV weights (head-major in each Ep)
    bqkv_ref,         # (L, 1, 3Ep)    f32
    wo_ref,           # (L, Ep, Ep)    bf16 output projection
    bo_ref,           # (L, 1, Ep)     f32
    w1_ref, b1_ref,   # (L, Ep, Fp) bf16, (L, 1, Fp) f32
    w2_ref, b2_ref,   # (L, Fp, Ep) bf16, (L, 1, Ep) f32
    ln1w_ref, ln1b_ref,               # (L, 1, Ep) f32  (zero-padded lanes)
    ln2w_ref, ln2b_ref,               # (L, 1, Ep) f32
    fnw_ref, fnb_ref,                 # (1, Ep)    f32  final LayerNorm (fused)
    o_ref,            # (Bt, Sp, Ep)
    mask_ref,         # VMEM scratch (Bt, Sp, Sp) f32 : combined causal+pad mask
    *, num_heads, num_layers, e_true, d_true,
):
    Bt, S, E = x_ref.shape            # E here is the padded (lane-aligned) width
    Dp = E // num_heads               # padded per-head dim
    scale = 1.0 / math.sqrt(d_true)   # scale uses the TRUE head dim
    inv_e = 1.0 / e_true              # LayerNorm divisor uses the TRUE embedding dim

    # combined causal + key-padding mask: built ONCE per grid step, stored in scratch
    row = jax.lax.broadcasted_iota(jnp.int32, (1, S, S), 1)
    col = jax.lax.broadcasted_iota(jnp.int32, (1, S, S), 2)
    causal = jnp.where(col <= row, 0.0, NEG_MASK).astype(jnp.float32)     # (1, S, S)
    mask_ref[...] = causal + padmask_ref[...]                             # (Bt, S, S)

    def layer_norm(x, w, b):
        # Padded lanes of x are exactly 0 and padded gamma/beta are 0, so using the
        # true-E divisor with sum / sum-of-squares reproduces unpadded LayerNorm and
        # keeps padded lanes at 0.
        mu = jnp.sum(x, axis=-1, keepdims=True) * inv_e
        ex2 = jnp.sum(x * x, axis=-1, keepdims=True) * inv_e
        var = ex2 - mu * mu
        return (x - mu) * jax.lax.rsqrt(var + LN_EPS) * w + b

    # flatten the tile so all projection / FFN matmuls see a tall (Bt*S, E) LHS
    x0 = x_ref[...].astype(jnp.float32).reshape(Bt * S, E)

    def layer_body(l, x):
        neg_mask = mask_ref[...]                               # re-read from scratch
        xb = x.astype(jnp.bfloat16)

        # ---- fused QKV projection: one (Bt*S, E) x (E, 3E) matmul ----
        qkv = jnp.dot(xb, wqkv_ref[l], preferred_element_type=jnp.float32) + bqkv_ref[l]

        ctx_heads = []
        for h in range(num_heads):                             # static; lane slices only
            q = qkv[:, 0 * E + h * Dp:0 * E + (h + 1) * Dp].reshape(Bt, S, Dp)
            k = qkv[:, 1 * E + h * Dp:1 * E + (h + 1) * Dp].reshape(Bt, S, Dp)
            v = qkv[:, 2 * E + h * Dp:2 * E + (h + 1) * Dp].reshape(Bt, S, Dp)

            s = jnp.einsum("bsd,btd->bst",
                           q.astype(jnp.bfloat16), k.astype(jnp.bfloat16),
                           preferred_element_type=jnp.float32) * scale + neg_mask
            m = jnp.max(s, axis=-1, keepdims=True)
            p = jnp.exp(s - m)
            p = p * pl.reciprocal(jnp.sum(p, axis=-1, keepdims=True), approx=True)

            ctx = jnp.einsum("bst,btd->bsd",
                             p.astype(jnp.bfloat16), v.astype(jnp.bfloat16),
                             preferred_element_type=jnp.float32)
            ctx_heads.append(ctx.reshape(Bt * S, Dp))

        # heads concatenated along lanes -> ONE full-depth (E, E) output projection
        ctx_all = ctx_heads[0] if num_heads == 1 else jnp.concatenate(ctx_heads, axis=-1)
        attn = jnp.dot(ctx_all.astype(jnp.bfloat16), wo_ref[l],
                       preferred_element_type=jnp.float32) + bo_ref[l]

        # ---- post-norm encoder layer (norm_first=False), dropout = identity ----
        x = layer_norm(x + attn, ln1w_ref[l], ln1b_ref[l])
        xb = x.astype(jnp.bfloat16)
        h1 = jnp.maximum(
            jnp.dot(xb, w1_ref[l], preferred_element_type=jnp.float32) + b1_ref[l], 0.0)
        ff = jnp.dot(h1.astype(jnp.bfloat16), w2_ref[l],
                     preferred_element_type=jnp.float32) + b2_ref[l]
        x = layer_norm(x + ff, ln2w_ref[l], ln2b_ref[l])
        return x

    if num_layers >= 4:
        # fori_loop bounds live ranges for deep stacks (weights already VMEM-resident)
        x = jax.lax.fori_loop(0, num_layers, layer_body, x0)
    else:
        x = x0
        for l in range(num_layers):
            x = layer_body(l, x)

    # ---- fused final LayerNorm ----
    x = layer_norm(x, fnw_ref[...], fnb_ref[...])
    o_ref[...] = x.reshape(Bt, S, E).astype(o_ref.dtype)


def _pack_params(params, num_heads, E, F, E_pad, F_pad):
    """One-time HBM-side rearrangement: stack layers, transpose to (in, out), fuse QKV,
    zero-pad E/F/head dims to lane-aligned sizes, cast matmul weights to bf16."""
    D = E // num_heads
    D_pad = E_pad // num_heads

    def pad2(a, r, c):
        a = jnp.asarray(a, jnp.float32)
        return jnp.pad(a, ((0, r - a.shape[0]), (0, c - a.shape[1])))

    def per_layer(lp):
        in_w_t = jnp.asarray(lp["in_w"], jnp.float32).T        # (E, 3E): cols = [q|k|v]
        in_b = jnp.asarray(lp["in_b"], jnp.float32).reshape(3 * E)

        wqkv = jnp.zeros((E_pad, 3 * E_pad), jnp.float32)
        bqkv = jnp.zeros((1, 3 * E_pad), jnp.float32)
        for s in range(3):                                     # q, k, v
            for h in range(num_heads):
                src_c = s * E + h * D
                dst_c = s * E_pad + h * D_pad
                wqkv = wqkv.at[:E, dst_c:dst_c + D].set(in_w_t[:, src_c:src_c + D])
                bqkv = bqkv.at[0, dst_c:dst_c + D].set(in_b[src_c:src_c + D])

        out_w_t = jnp.asarray(lp["out_w"], jnp.float32).T      # (E_concat_heads, E)
        wo = jnp.zeros((E_pad, E_pad), jnp.float32)
        for h in range(num_heads):
            wo = wo.at[h * D_pad:h * D_pad + D, :E].set(out_w_t[h * D:(h + 1) * D, :])
        bo = pad2(jnp.asarray(lp["out_b"]).reshape(1, E), 1, E_pad)

        w1 = pad2(jnp.asarray(lp["w1"]).T, E_pad, F_pad)       # (E,F) zero-padded
        b1 = pad2(jnp.asarray(lp["b1"]).reshape(1, F), 1, F_pad)
        w2 = pad2(jnp.asarray(lp["w2"]).T, F_pad, E_pad)       # (F,E) zero-padded
        b2 = pad2(jnp.asarray(lp["b2"]).reshape(1, E), 1, E_pad)

        def pad_ln(a):   # zero-padding gamma/beta keeps padded activation lanes at 0
            return pad2(jnp.asarray(a).reshape(1, E), 1, E_pad)

        return dict(wqkv=wqkv, bqkv=bqkv, wo=wo, bo=bo, w1=w1, b1=b1, w2=w2, b2=b2,
                    ln1w=pad_ln(lp["ln1_w"]), ln1b=pad_ln(lp["ln1_b"]),
                    ln2w=pad_ln(lp["ln2_w"]), ln2b=pad_ln(lp["ln2_b"]))

    per = [per_layer(lp) for lp in params["layers"]]
    packed = {k: jnp.stack([p[k] for p in per]) for k in per[0]}
    packed["fnw"] = pad2(jnp.asarray(params["norm_w"]).reshape(1, E), 1, E_pad)
    packed["fnb"] = pad2(jnp.asarray(params["norm_b"]).reshape(1, E), 1, E_pad)

    # bf16 for MXU operands; biases / LayerNorm params stay f32 (VPU path).
    for k in ("wqkv", "wo", "w1", "w2"):
        packed[k] = packed[k].astype(jnp.bfloat16)
    return packed


def sasrec_forward(user_embeddings, past_lengths, params, num_heads, block_b=None):
    B, S, E = user_embeddings.shape
    num_layers = len(params["layers"])
    F = int(jnp.asarray(params["layers"][0]["b1"]).reshape(-1).shape[0])

    E_pad = _round_up(max(E, 128), 128)       # lane-dense activations / outputs
    F_pad = _round_up(max(F, 128), 128)
    S_pad = _round_up(S, 8)                   # sublane-aligned sequence

    # position-embedding lookup for arange(S) is a slice; the add is trivial glue.
    x = user_embeddings.astype(jnp.float32) + params["pos_emb"][None, :S, :]

    # batch-tile size: target ~512 rows per tile but keep >= 2 balanced tiles when
    # the batch allows it (v7x has 2 TensorCores on the "parallel" grid axis).
    if block_b is None:
        block_b = max(1, min(B, max(1, 512 // S_pad)))
        if B >= 2:
            block_b = min(block_b, -(-B // 2))
    n_tiles = -(-B // block_b)
    B_pad = n_tiles * block_b

    lengths = past_lengths.astype(jnp.int32)
    x = jnp.pad(x, ((0, B_pad - B), (0, S_pad - S), (0, E_pad - E)))
    lengths = jnp.pad(lengths, (0, B_pad - B))   # padded rows fully masked, sliced off

    # additive f32 key-padding mask, computed once in the wrapper (layer/head invariant)
    key_pos = jnp.arange(S_pad, dtype=jnp.int32)[None, :]
    pad_neg = jnp.where(key_pos < lengths[:, None], 0.0, NEG_MASK).astype(jnp.float32)
    pad_neg = pad_neg.reshape(B_pad, 1, S_pad)

    packed = _pack_params(params, num_heads, E, F, E_pad, F_pad)
    weights = [packed[k] for k in PACKED_ORDER]

    # VMEM budget: resident weights (bf16) + activation tiles + score/mask buffers,
    # capped safely below physical VMEM (64 MiB on v7x, 128 MiB on v5e/v6e).
    weight_bytes = sum(int(w.size) * w.dtype.itemsize for w in weights)
    tile_bytes = block_b * S_pad * E_pad * 4
    score_bytes = block_b * S_pad * S_pad * 4
    vmem_limit = int(2 * weight_bytes + 12 * tile_bytes + 6 * score_bytes + (4 << 20))
    try:
        phys_vmem = int(pltpu.get_tpu_info().vmem_capacity_bytes)
    except Exception:
        phys_vmem = 64 << 20
    vmem_limit = max(32 << 20, min(vmem_limit, phys_vmem - (8 << 20)))

    def _full_spec(a):
        idx_maps = {2: lambda i: (0, 0), 3: lambda i: (0, 0, 0)}
        return pl.BlockSpec(a.shape, idx_maps[a.ndim])

    kernel = functools.partial(
        sasrec_kernel, num_heads=num_heads, num_layers=num_layers,
        e_true=E, d_true=E // num_heads)

    out = pl.pallas_call(
        kernel,
        out_shape=jax.ShapeDtypeStruct((B_pad, S_pad, E_pad), jnp.float32),
        grid=(n_tiles,),
        in_specs=[
            pl.BlockSpec((block_b, S_pad, E_pad), lambda i: (i, 0, 0)),
            pl.BlockSpec((block_b, 1, S_pad), lambda i: (i, 0, 0)),
        ] + [_full_spec(w) for w in weights],
        out_specs=pl.BlockSpec((block_b, S_pad, E_pad), lambda i: (i, 0, 0)),
        scratch_shapes=[pltpu.VMEM((block_b, S_pad, S_pad), jnp.float32)],
        compiler_params=pltpu.CompilerParams(
            dimension_semantics=("parallel",),      # independent batch tiles
            vmem_limit_bytes=vmem_limit,
        ),
    )(x, pad_neg, *weights)
    return out[:B, :S, :E].astype(user_embeddings.dtype)


def sasrec_reference(user_embeddings, past_lengths, params, num_heads):
    """Pure-JAX reference of the PyTorch forward (post-norm encoder, eval mode)."""
    B, S, E = user_embeddings.shape
    D = E // num_heads
    x = user_embeddings.astype(jnp.float32) + params["pos_emb"][None, :S, :]

    key_valid = jnp.arange(S)[None, :] < past_lengths[:, None]          # (B, S)
    causal = jnp.tril(jnp.ones((S, S), bool))
    neg = jnp.where(causal[None, :, :] & key_valid[:, None, :], 0.0, NEG_MASK)

    def ln(x, w, b):
        mu = x.mean(-1, keepdims=True)
        var = ((x - mu) ** 2).mean(-1, keepdims=True)
        return (x - mu) / jnp.sqrt(var + LN_EPS) * w.reshape(-1) + b.reshape(-1)

    for lp in params["layers"]:
        qkv = x @ lp["in_w"].T + lp["in_b"].reshape(-1)
        q, k, v = jnp.split(qkv, 3, axis=-1)
        q = q.reshape(B, S, num_heads, D).transpose(0, 2, 1, 3)
        k = k.reshape(B, S, num_heads, D).transpose(0, 2, 1, 3)
        v = v.reshape(B, S, num_heads, D).transpose(0, 2, 1, 3)
        s = jnp.einsum("bhsd,bhtd->bhst", q, k) / math.sqrt(D) + neg[:, None]
        p = jax.nn.softmax(s, axis=-1)
        ctx = jnp.einsum("bhst,bhtd->bhsd", p, v).transpose(0, 2, 1, 3).reshape(B, S, E)
        attn = ctx @ lp["out_w"].T + lp["out_b"].reshape(-1)
        x = ln(x + attn, lp["ln1_w"], lp["ln1_b"])
        h1 = jax.nn.relu(x @ lp["w1"].T + lp["b1"].reshape(-1))
        ff = h1 @ lp["w2"].T + lp["b2"].reshape(-1)
        x = ln(x + ff, lp["ln2_w"], lp["ln2_b"])
    return ln(x, params["norm_w"], params["norm_b"])


def init_params(key, max_seq_len, E, num_blocks, ffn_hidden):
    keys = jax.random.split(key, 1 + num_blocks)
    params = {
        "pos_emb": 0.02 * jax.random.normal(keys[0], (max_seq_len, E), jnp.float32),
        "norm_w": jnp.ones((1, E), jnp.float32),
        "norm_b": jnp.zeros((1, E), jnp.float32),
        "layers": [],
    }
    for i in range(num_blocks):
        k = jax.random.split(keys[1 + i], 4)
        params["layers"].append(dict(
            in_w=0.02 * jax.random.normal(k[0], (3 * E, E), jnp.float32),
            in_b=jnp.zeros((1, 3 * E), jnp.float32),
            out_w=0.02 * jax.random.normal(k[1], (E, E), jnp.float32),
            out_b=jnp.zeros((1, E), jnp.float32),
            w1=0.02 * jax.random.normal(k[2], (ffn_hidden, E), jnp.float32),
            b1=jnp.zeros((1, ffn_hidden), jnp.float32),
            w2=0.02 * jax.random.normal(k[3], (E, ffn_hidden), jnp.float32),
            b2=jnp.zeros((1, E), jnp.float32),
            ln1_w=jnp.ones((1, E), jnp.float32),
            ln1_b=jnp.zeros((1, E), jnp.float32),
            ln2_w=jnp.ones((1, E), jnp.float32),
            ln2_b=jnp.zeros((1, E), jnp.float32),
        ))
    return params


if __name__ == "__main__":
    B, S, E = 2, 8, 32
    NUM_BLOCKS, NUM_HEADS, FFN_HIDDEN = 2, 2, 64

    key = jax.random.PRNGKey(0)
    kp, kx = jax.random.split(key)
    params = init_params(kp, max_seq_len=S, E=E, num_blocks=NUM_BLOCKS,
                         ffn_hidden=FFN_HIDDEN)

    user_embeddings = jax.random.normal(kx, (B, S, E), jnp.float32)
    past_lengths = jnp.array([5, 8], dtype=jnp.int32)

    out = sasrec_forward(user_embeddings, past_lengths, params, NUM_HEADS)
    jax.block_until_ready(out)

    ref = sasrec_reference(user_embeddings, past_lengths, params, NUM_HEADS)
    err = float(jnp.max(jnp.abs(out - ref)))

    assert out.shape == (B, S, E) and bool(jnp.all(jnp.isfinite(out)))
    assert err < 0.1, f"max abs error vs reference: {err}"
    print("KERNEL_OK")
</pallas_src>

<mosaic_0001>
module attributes {stable_mosaic.version = 11 : i64} {
  func.func @sasrec_kernel(%arg0: i32, %arg1: memref<1x8x128xf32, #tpu.memory_space<vmem>>, %arg2: memref<1x1x8xf32, #tpu.memory_space<vmem>>, %arg3: memref<2x128x384xbf16, #tpu.memory_space<vmem>>, %arg4: memref<2x1x384xf32, #tpu.memory_space<vmem>>, %arg5: memref<2x128x128xbf16, #tpu.memory_space<vmem>>, %arg6: memref<2x1x128xf32, #tpu.memory_space<vmem>>, %arg7: memref<2x128x128xbf16, #tpu.memory_space<vmem>>, %arg8: memref<2x1x128xf32, #tpu.memory_space<vmem>>, %arg9: memref<2x128x128xbf16, #tpu.memory_space<vmem>>, %arg10: memref<2x1x128xf32, #tpu.memory_space<vmem>>, %arg11: memref<2x1x128xf32, #tpu.memory_space<vmem>>, %arg12: memref<2x1x128xf32, #tpu.memory_space<vmem>>, %arg13: memref<2x1x128xf32, #tpu.memory_space<vmem>>, %arg14: memref<2x1x128xf32, #tpu.memory_space<vmem>>, %arg15: memref<1x128xf32, #tpu.memory_space<vmem>>, %arg16: memref<1x128xf32, #tpu.memory_space<vmem>>, %arg17: memref<1x8x128xf32, #tpu.memory_space<vmem>>, %arg18: memref<1x8x8xf32, #tpu.memory_space<vmem>>) attributes {dimension_semantics = [#tpu.dimension_semantics<parallel>], iteration_bounds = array<i64: 2>, scalar_prefetch = 0 : i64, scratch_operands = 1 : i64, tpu.core_type = #tpu.core_type<tc>, window_params = [{transform_indices = @transform_0, window_bounds = array<i64: 1, 8, 128>}, {transform_indices = @transform_1, window_bounds = array<i64: 1, 1, 8>}, {pipeline_mode = #tpu.pipeline_mode<synchronous>, transform_indices = @transform_2, window_bounds = array<i64: 2, 128, 384>}, {pipeline_mode = #tpu.pipeline_mode<synchronous>, transform_indices = @transform_3, window_bounds = array<i64: 2, 1, 384>}, {pipeline_mode = #tpu.pipeline_mode<synchronous>, transform_indices = @transform_4, window_bounds = array<i64: 2, 128, 128>}, {pipeline_mode = #tpu.pipeline_mode<synchronous>, transform_indices = @transform_5, window_bounds = array<i64: 2, 1, 128>}, {pipeline_mode = #tpu.pipeline_mode<synchronous>, transform_indices = @transform_6, window_bounds = array<i64: 2, 128, 128>}, {pipeline_mode = #tpu.pipeline_mode<synchronous>, transform_indices = @transform_7, window_bounds = array<i64: 2, 1, 128>}, {pipeline_mode = #tpu.pipeline_mode<synchronous>, transform_indices = @transform_8, window_bounds = array<i64: 2, 128, 128>}, {pipeline_mode = #tpu.pipeline_mode<synchronous>, transform_indices = @transform_9, window_bounds = array<i64: 2, 1, 128>}, {pipeline_mode = #tpu.pipeline_mode<synchronous>, transform_indices = @transform_10, window_bounds = array<i64: 2, 1, 128>}, {pipeline_mode = #tpu.pipeline_mode<synchronous>, transform_indices = @transform_11, window_bounds = array<i64: 2, 1, 128>}, {pipeline_mode = #tpu.pipeline_mode<synchronous>, transform_indices = @transform_12, window_bounds = array<i64: 2, 1, 128>}, {pipeline_mode = #tpu.pipeline_mode<synchronous>, transform_indices = @transform_13, window_bounds = array<i64: 2, 1, 128>}, {pipeline_mode = #tpu.pipeline_mode<synchronous>, transform_indices = @transform_14, window_bounds = array<i64: 1, 128>}, {pipeline_mode = #tpu.pipeline_mode<synchronous>, transform_indices = @transform_15, window_bounds = array<i64: 1, 128>}, {transform_indices = @transform_16, window_bounds = array<i64: 1, 8, 128>}]} {
    %0 = tpu.iota {dimensions = array<i32: 1>} : vector<1x8x8xi32>
    %1 = tpu.iota {dimensions = array<i32: 2>} : vector<1x8x8xi32>
    %2 = arith.cmpi sle, %1, %0 : vector<1x8x8xi32>
    %cst = arith.constant 0.000000e+00 : f32
    %cst_0 = arith.constant -1.000000e+30 : f32
    %3 = vector.broadcast %cst : f32 to vector<1x8x8xf32>
    %4 = vector.broadcast %cst_0 : f32 to vector<1x8x8xf32>
    %5 = arith.select %2, %3, %4 : vector<1x8x8xi1>, vector<1x8x8xf32>
    %c0 = arith.constant 0 : index
    %c0_1 = arith.constant 0 : index
    %c0_2 = arith.constant 0 : index
    %6 = vector.load %arg2[%c0, %c0_1, %c0_2] : memref<1x1x8xf32, #tpu.memory_space<vmem>>, vector<1x1x8xf32>
    %7 = vector.broadcast %6 : vector<1x1x8xf32> to vector<1x8x8xf32>
    %8 = arith.addf %5, %7 : vector<1x8x8xf32>
    %c0_3 = arith.constant 0 : index
    %c0_4 = arith.constant 0 : index
    %c0_5 = arith.constant 0 : index
    %9 = vector.load %arg18[%c0_3, %c0_4, %c0_5] : memref<1x8x8xf32, #tpu.memory_space<vmem>>, vector<1x8x8xf32>
    tpu.vector_store %arg18[%c0_3, %c0_4, %c0_5], %8 {strides = array<i32>} : memref<1x8x8xf32, #tpu.memory_space<vmem>>, vector<1x8x8xf32>,
    %c0_6 = arith.constant 0 : index
    %c0_7 = arith.constant 0 : index
    %c0_8 = arith.constant 0 : index
    %10 = vector.load %arg1[%c0_6, %c0_7, %c0_8] : memref<1x8x128xf32, #tpu.memory_space<vmem>>, vector<1x8x128xf32>
    %11 = vector.shape_cast %10 : vector<1x8x128xf32> to vector<8x128xf32>
    %c0_9 = arith.constant 0 : index
    %c0_10 = arith.constant 0 : index
    %c0_11 = arith.constant 0 : index
    %12 = vector.load %arg18[%c0_9, %c0_10, %c0_11] : memref<1x8x8xf32, #tpu.memory_space<vmem>>, vector<1x8x8xf32>
    %13 = arith.truncf %11 : vector<8x128xf32> to vector<8x128xbf16>
    %c0_12 = arith.constant 0 : index
    %c0_13 = arith.constant 0 : index
    %c0_14 = arith.constant 0 : index
    %14 = vector.load %arg3[%c0_12, %c0_13, %c0_14] : memref<2x128x384xbf16, #tpu.memory_space<vmem>>, vector<1x128x384xbf16>
    %15 = vector.shape_cast %14 : vector<1x128x384xbf16> to vector<128x384xbf16>
    %cst_15 = arith.constant dense<0.000000e+00> : vector<8x384xf32>
    %16 = tpu.matmul %13, %15, %cst_15 {dimension_numbers = #tpu.dot_dimension_numbers<[1], [0], [0], [1], [0, 0, 1, 1], [], []>} : vector<8x128xbf16>, vector<128x384xbf16>, vector<8x384xf32> -> vector<8x384xf32>
    %c0_16 = arith.constant 0 : index
    %c0_17 = arith.constant 0 : index
    %c0_18 = arith.constant 0 : index
    %17 = vector.load %arg4[%c0_16, %c0_17, %c0_18] : memref<2x1x384xf32, #tpu.memory_space<vmem>>, vector<1x1x384xf32>
    %18 = vector.shape_cast %17 : vector<1x1x384xf32> to vector<1x384xf32>
    %19 = vector.broadcast %18 : vector<1x384xf32> to vector<8x384xf32>
    %20 = arith.addf %16, %19 : vector<8x384xf32>
    %21 = vector.extract_strided_slice %20 {offsets = [0, 0], sizes = [8, 64], strides = [1, 1]} : vector<8x384xf32> to vector<8x64xf32>
    %22 = vector.shape_cast %21 : vector<8x64xf32> to vector<1x8x64xf32>
    %23 = vector.extract_strided_slice %20 {offsets = [0, 128], sizes = [8, 64], strides = [1, 1]} : vector<8x384xf32> to vector<8x64xf32>
    %24 = vector.shape_cast %23 : vector<8x64xf32> to vector<1x8x64xf32>
    %25 = vector.extract_strided_slice %20 {offsets = [0, 256], sizes = [8, 64], strides = [1, 1]} : vector<8x384xf32> to vector<8x64xf32>
    %26 = vector.shape_cast %25 : vector<8x64xf32> to vector<1x8x64xf32>
    %27 = arith.truncf %22 : vector<1x8x64xf32> to vector<1x8x64xbf16>
    %28 = arith.truncf %24 : vector<1x8x64xf32> to vector<1x8x64xbf16>
    "tpu.trace_start"() <{level = 10 : i32, message = "bsd,btd->bst"}> : () -> ()
    %cst_19 = arith.constant dense<0.000000e+00> : vector<1x8x8xf32>
    %29 = tpu.matmul %27, %28, %cst_19 {dimension_numbers = #tpu.dot_dimension_numbers<[2], [2], [1], [1], [0, 0, 0, 1, 1, 1], [0], [0]>} : vector<1x8x64xbf16>, vector<1x8x64xbf16>, vector<1x8x8xf32> -> vector<1x8x8xf32>
    "tpu.trace_stop"() : () -> ()
    %cst_20 = arith.constant 2.500000e-01 : f32
    %30 = vector.broadcast %cst_20 : f32 to vector<1x8x8xf32>
    %31 = arith.mulf %29, %30 : vector<1x8x8xf32>
    %32 = arith.addf %31, %12 : vector<1x8x8xf32>
    %cst_21 = arith.constant dense<0xFF800000> : vector<1x8xf32>
    %33 = vector.multi_reduction <maximumf>, %32, %cst_21 [2] : vector<1x8x8xf32> to vector<1x8xf32>
    %34 = vector.shape_cast %33 : vector<1x8xf32> to vector<1x8x1xf32>
    %35 = vector.broadcast %34 : vector<1x8x1xf32> to vector<1x8x8xf32>
    %36 = arith.subf %32, %35 : vector<1x8x8xf32>
    %37 = math.exp %36 : vector<1x8x8xf32>
    %cst_22 = arith.constant dense<0.000000e+00> : vector<1x8xf32>
    %38 = vector.multi_reduction <add>, %37, %cst_22 [2] : vector<1x8x8xf32> to vector<1x8xf32>
    %39 = vector.shape_cast %38 : vector<1x8xf32> to vector<1x8x1xf32>
    %40 = tpu.reciprocal %39 {approx = true} : vector<1x8x1xf32> -> vector<1x8x1xf32>
    %41 = vector.broadcast %40 : vector<1x8x1xf32> to vector<1x8x8xf32>
    %42 = arith.mulf %37, %41 : vector<1x8x8xf32>
    %43 = arith.truncf %42 : vector<1x8x8xf32> to vector<1x8x8xbf16>
    %44 = arith.truncf %26 : vector<1x8x64xf32> to vector<1x8x64xbf16>
    "tpu.trace_start"() <{level = 10 : i32, message = "bst,btd->bsd"}> : () -> ()
    %cst_23 = arith.constant dense<0.000000e+00> : vector<1x8x64xf32>
    %45 = tpu.matmul %43, %44, %cst_23 {dimension_numbers = #tpu.dot_dimension_numbers<[2], [1], [1], [2], [0, 0, 0, 1, 1, 2], [0], [0]>} : vector<1x8x8xbf16>, vector<1x8x64xbf16>, vector<1x8x64xf32> -> vector<1x8x64xf32>
    "tpu.trace_stop"() : () -> ()
    %46 = vector.shape_cast %45 : vector<1x8x64xf32> to vector<8x64xf32>
    %47 = vector.extract_strided_slice %20 {offsets = [0, 64], sizes = [8, 64], strides = [1, 1]} : vector<8x384xf32> to vector<8x64xf32>
    %48 = vector.shape_cast %47 : vector<8x64xf32> to vector<1x8x64xf32>
    %49 = vector.extract_strided_slice %20 {offsets = [0, 192], sizes = [8, 64], strides = [1, 1]} : vector<8x384xf32> to vector<8x64xf32>
    %50 = vector.shape_cast %49 : vector<8x64xf32> to vector<1x8x64xf32>
    %51 = vector.extract_strided_slice %20 {offsets = [0, 320], sizes = [8, 64], strides = [1, 1]} : vector<8x384xf32> to vector<8x64xf32>
    %52 = vector.shape_cast %51 : vector<8x64xf32> to vector<1x8x64xf32>
    %53 = arith.truncf %48 : vector<1x8x64xf32> to vector<1x8x64xbf16>
    %54 = arith.truncf %50 : vector<1x8x64xf32> to vector<1x8x64xbf16>
    "tpu.trace_start"() <{level = 10 : i32, message = "bsd,btd->bst"}> : () -> ()
    %cst_24 = arith.constant dense<0.000000e+00> : vector<1x8x8xf32>
    %55 = tpu.matmul %53, %54, %cst_24 {dimension_numbers = #tpu.dot_dimension_numbers<[2], [2], [1], [1], [0, 0, 0, 1, 1, 1], [0], [0]>} : vector<1x8x64xbf16>, vector<1x8x64xbf16>, vector<1x8x8xf32> -> vector<1x8x8xf32>
    "tpu.trace_stop"() : () -> ()
    %cst_25 = arith.constant 2.500000e-01 : f32
    %56 = vector.broadcast %cst_25 : f32 to vector<1x8x8xf32>
    %57 = arith.mulf %55, %56 : vector<1x8x8xf32>
    %58 = arith.addf %57, %12 : vector<1x8x8xf32>
    %cst_26 = arith.constant dense<0xFF800000> : vector<1x8xf32>
    %59 = vector.multi_reduction <maximumf>, %58, %cst_26 [2] : vector<1x8x8xf32> to vector<1x8xf32>
    %60 = vector.shape_cast %59 : vector<1x8xf32> to vector<1x8x1xf32>
    %61 = vector.broadcast %60 : vector<1x8x1xf32> to vector<1x8x8xf32>
    %62 = arith.subf %58, %61 : vector<1x8x8xf32>
    %63 = math.exp %62 : vector<1x8x8xf32>
    %cst_27 = arith.constant dense<0.000000e+00> : vector<1x8xf32>
    %64 = vector.multi_reduction <add>, %63, %cst_27 [2] : vector<1x8x8xf32> to vector<1x8xf32>
    %65 = vector.shape_cast %64 : vector<1x8xf32> to vector<1x8x1xf32>
    %66 = tpu.reciprocal %65 {approx = true} : vector<1x8x1xf32> -> vector<1x8x1xf32>
    %67 = vector.broadcast %66 : vector<1x8x1xf32> to vector<1x8x8xf32>
    %68 = arith.mulf %63, %67 : vector<1x8x8xf32>
    %69 = arith.truncf %68 : vector<1x8x8xf32> to vector<1x8x8xbf16>
    %70 = arith.truncf %52 : vector<1x8x64xf32> to vector<1x8x64xbf16>
    "tpu.trace_start"() <{level = 10 : i32, message = "bst,btd->bsd"}> : () -> ()
    %cst_28 = arith.constant dense<0.000000e+00> : vector<1x8x64xf32>
    %71 = tpu.matmul %69, %70, %cst_28 {dimension_numbers = #tpu.dot_dimension_numbers<[2], [1], [1], [2], [0, 0, 0, 1, 1, 2], [0], [0]>} : vector<1x8x8xbf16>, vector<1x8x64xbf16>, vector<1x8x64xf32> -> vector<1x8x64xf32>
    "tpu.trace_stop"() : () -> ()
    %72 = vector.shape_cast %71 : vector<1x8x64xf32> to vector<8x64xf32>
    %73 = tpu.concatenate %46, %72 in 1 : vector<8x64xf32>, vector<8x64xf32> -> vector<8x128xf32>
    %74 = arith.truncf %73 : vector<8x128xf32> to vector<8x128xbf16>
    %c0_29 = arith.constant 0 : index
    %c0_30 = arith.constant 0 : index
    %c0_31 = arith.constant 0 : index
    %75 = vector.load %arg5[%c0_29, %c0_30, %c0_31] : memref<2x128x128xbf16, #tpu.memory_space<vmem>>, vector<1x128x128xbf16>
    %76 = vector.shape_cast %75 : vector<1x128x128xbf16> to vector<128x128xbf16>
    %cst_32 = arith.constant dense<0.000000e+00> : vector<8x128xf32>
    %77 = tpu.matmul %74, %76, %cst_32 {dimension_numbers = #tpu.dot_dimension_numbers<[1], [0], [0], [1], [0, 0, 1, 1], [], []>} : vector<8x128xbf16>, vector<128x128xbf16>, vector<8x128xf32> -> vector<8x128xf32>
    %c0_33 = arith.constant 0 : index
    %c0_34 = arith.constant 0 : index
    %c0_35 = arith.constant 0 : index
    %78 = vector.load %arg6[%c0_33, %c0_34, %c0_35] : memref<2x1x128xf32, #tpu.memory_space<vmem>>, vector<1x1x128xf32>
    %79 = vector.shape_cast %78 : vector<1x1x128xf32> to vector<1x128xf32>
    %80 = vector.broadcast %79 : vector<1x128xf32> to vector<8x128xf32>
    %81 = arith.addf %77, %80 : vector<8x128xf32>
    %82 = arith.addf %11, %81 : vector<8x128xf32>
    %c0_36 = arith.constant 0 : index
    %c0_37 = arith.constant 0 : index
    %c0_38 = arith.constant 0 : index
    %83 = vector.load %arg11[%c0_36, %c0_37, %c0_38] : memref<2x1x128xf32, #tpu.memory_space<vmem>>, vector<1x1x128xf32>
    %84 = vector.shape_cast %83 : vector<1x1x128xf32> to vector<1x128xf32>
    %c0_39 = arith.constant 0 : index
    %c0_40 = arith.constant 0 : index
    %c0_41 = arith.constant 0 : index
    %85 = vector.load %arg12[%c0_39, %c0_40, %c0_41] : memref<2x1x128xf32, #tpu.memory_space<vmem>>, vector<1x1x128xf32>
    %86 = vector.shape_cast %85 : vector<1x1x128xf32> to vector<1x128xf32>
    %cst_42 = arith.constant dense<0.000000e+00> : vector<8xf32>
    %87 = vector.multi_reduction <add>, %82, %cst_42 [1] : vector<8x128xf32> to vector<8xf32>
    %88 = vector.shape_cast %87 : vector<8xf32> to vector<8x1xf32>
    %cst_43 = arith.constant 3.125000e-02 : f32
    %89 = vector.broadcast %cst_43 : f32 to vector<8x1xf32>
    %90 = arith.mulf %88, %89 : vector<8x1xf32>
    %91 = arith.mulf %82, %82 : vector<8x128xf32>
    %cst_44 = arith.constant dense<0.000000e+00> : vector<8xf32>
    %92 = vector.multi_reduction <add>, %91, %cst_44 [1] : vector<8x128xf32> to vector<8xf32>
    %93 = vector.shape_cast %92 : vector<8xf32> to vector<8x1xf32>
    %cst_45 = arith.constant 3.125000e-02 : f32
    %94 = vector.broadcast %cst_45 : f32 to vector<8x1xf32>
    %95 = arith.mulf %93, %94 : vector<8x1xf32>
    %96 = arith.mulf %90, %90 : vector<8x1xf32>
    %97 = arith.subf %95, %96 : vector<8x1xf32>
    %98 = vector.broadcast %90 : vector<8x1xf32> to vector<8x128xf32>
    %99 = arith.subf %82, %98 : vector<8x128xf32>
    %cst_46 = arith.constant 9.99999974E-6 : f32
    %100 = vector.broadcast %cst_46 : f32 to vector<8x1xf32>
    %101 = arith.addf %97, %100 : vector<8x1xf32>
    %102 = math.rsqrt %101 : vector<8x1xf32>
    %103 = vector.broadcast %102 : vector<8x1xf32> to vector<8x128xf32>
    %104 = arith.mulf %99, %103 : vector<8x128xf32>
    %105 = vector.broadcast %84 : vector<1x128xf32> to vector<8x128xf32>
    %106 = arith.mulf %104, %105 : vector<8x128xf32>
    %107 = vector.broadcast %86 : vector<1x128xf32> to vector<8x128xf32>
    %108 = arith.addf %106, %107 : vector<8x128xf32>
    %109 = arith.truncf %108 : vector<8x128xf32> to vector<8x128xbf16>
    %c0_47 = arith.constant 0 : index
    %c0_48 = arith.constant 0 : index
    %c0_49 = arith.constant 0 : index
    %110 = vector.load %arg7[%c0_47, %c0_48, %c0_49] : memref<2x128x128xbf16, #tpu.memory_space<vmem>>, vector<1x128x128xbf16>
    %111 = vector.shape_cast %110 : vector<1x128x128xbf16> to vector<128x128xbf16>
    %cst_50 = arith.constant dense<0.000000e+00> : vector<8x128xf32>
    %112 = tpu.matmul %109, %111, %cst_50 {dimension_numbers = #tpu.dot_dimension_numbers<[1], [0], [0], [1], [0, 0, 1, 1], [], []>} : vector<8x128xbf16>, vector<128x128xbf16>, vector<8x128xf32> -> vector<8x128xf32>
    %c0_51 = arith.constant 0 : index
    %c0_52 = arith.constant 0 : index
    %c0_53 = arith.constant 0 : index
    %113 = vector.load %arg8[%c0_51, %c0_52, %c0_53] : memref<2x1x128xf32, #tpu.memory_space<vmem>>, vector<1x1x128xf32>
    %114 = vector.shape_cast %113 : vector<1x1x128xf32> to vector<1x128xf32>
    %115 = vector.broadcast %114 : vector<1x128xf32> to vector<8x128xf32>
    %116 = arith.addf %112, %115 : vector<8x128xf32>
    %cst_54 = arith.constant 0.000000e+00 : f32
    %117 = vector.broadcast %cst_54 : f32 to vector<8x128xf32>
    %118 = arith.maximumf %116, %117 : vector<8x128xf32>
    %119 = arith.truncf %118 : vector<8x128xf32> to vector<8x128xbf16>
    %c0_55 = arith.constant 0 : index
    %c0_56 = arith.constant 0 : index
    %c0_57 = arith.constant 0 : index
    %120 = vector.load %arg9[%c0_55, %c0_56, %c0_57] : memref<2x128x128xbf16, #tpu.memory_space<vmem>>, vector<1x128x128xbf16>
    %121 = vector.shape_cast %120 : vector<1x128x128xbf16> to vector<128x128xbf16>
    %cst_58 = arith.constant dense<0.000000e+00> : vector<8x128xf32>
    %122 = tpu.matmul %119, %121, %cst_58 {dimension_numbers = #tpu.dot_dimension_numbers<[1], [0], [0], [1], [0, 0, 1, 1], [], []>} : vector<8x128xbf16>, vector<128x128xbf16>, vector<8x128xf32> -> vector<8x128xf32>
    %c0_59 = arith.constant 0 : index
    %c0_60 = arith.constant 0 : index
    %c0_61 = arith.constant 0 : index
    %123 = vector.load %arg10[%c0_59, %c0_60, %c0_61] : memref<2x1x128xf32, #tpu.memory_space<vmem>>, vector<1x1x128xf32>
    %124 = vector.shape_cast %123 : vector<1x1x128xf32> to vector<1x128xf32>
    %125 = vector.broadcast %124 : vector<1x128xf32> to vector<8x128xf32>
    %126 = arith.addf %122, %125 : vector<8x128xf32>
    %127 = arith.addf %108, %126 : vector<8x128xf32>
    %c0_62 = arith.constant 0 : index
    %c0_63 = arith.constant 0 : index
    %c0_64 = arith.constant 0 : index
    %128 = vector.load %arg13[%c0_62, %c0_63, %c0_64] : memref<2x1x128xf32, #tpu.memory_space<vmem>>, vector<1x1x128xf32>
    %129 = vector.shape_cast %128 : vector<1x1x128xf32> to vector<1x128xf32>
    %c0_65 = arith.constant 0 : index
    %c0_66 = arith.constant 0 : index
    %c0_67 = arith.constant 0 : index
    %130 = vector.load %arg14[%c0_65, %c0_66, %c0_67] : memref<2x1x128xf32, #tpu.memory_space<vmem>>, vector<1x1x128xf32>
    %131 = vector.shape_cast %130 : vector<1x1x128xf32> to vector<1x128xf32>
    %cst_68 = arith.constant dense<0.000000e+00> : vector<8xf32>
    %132 = vector.multi_reduction <add>, %127, %cst_68 [1] : vector<8x128xf32> to vector<8xf32>
    %133 = vector.shape_cast %132 : vector<8xf32> to vector<8x1xf32>
    %cst_69 = arith.constant 3.125000e-02 : f32
    %134 = vector.broadcast %cst_69 : f32 to vector<8x1xf32>
    %135 = arith.mulf %133, %134 : vector<8x1xf32>
    %136 = arith.mulf %127, %127 : vector<8x128xf32>
    %cst_70 = arith.constant dense<0.000000e+00> : vector<8xf32>
    %137 = vector.multi_reduction <add>, %136, %cst_70 [1] : vector<8x128xf32> to vector<8xf32>
    %138 = vector.shape_cast %137 : vector<8xf32> to vector<8x1xf32>
    %cst_71 = arith.constant 3.125000e-02 : f32
    %139 = vector.broadcast %cst_71 : f32 to vector<8x1xf32>
    %140 = arith.mulf %138, %139 : vector<8x1xf32>
    %141 = arith.mulf %135, %135 : vector<8x1xf32>
    %142 = arith.subf %140, %141 : vector<8x1xf32>
    %143 = vector.broadcast %135 : vector<8x1xf32> to vector<8x128xf32>
    %144 = arith.subf %127, %143 : vector<8x128xf32>
    %cst_72 = arith.constant 9.99999974E-6 : f32
    %145 = vector.broadcast %cst_72 : f32 to vector<8x1xf32>
    %146 = arith.addf %142, %145 : vector<8x1xf32>
    %147 = math.rsqrt %146 : vector<8x1xf32>
    %148 = vector.broadcast %147 : vector<8x1xf32> to vector<8x128xf32>
    %149 = arith.mulf %144, %148 : vector<8x128xf32>
    %150 = vector.broadcast %129 : vector<1x128xf32> to vector<8x128xf32>
    %151 = arith.mulf %149, %150 : vector<8x128xf32>
    %152 = vector.broadcast %131 : vector<1x128xf32> to vector<8x128xf32>
    %153 = arith.addf %151, %152 : vector<8x128xf32>
    %c0_73 = arith.constant 0 : index
    %c0_74 = arith.constant 0 : index
    %c0_75 = arith.constant 0 : index
    %154 = vector.load %arg18[%c0_73, %c0_74, %c0_75] : memref<1x8x8xf32, #tpu.memory_space<vmem>>, vector<1x8x8xf32>
    %155 = arith.truncf %153 : vector<8x128xf32> to vector<8x128xbf16>
    %c1 = arith.constant 1 : index
    %c0_76 = arith.constant 0 : index
    %c0_77 = arith.constant 0 : index
    %156 = vector.load %arg3[%c1, %c0_76, %c0_77] : memref<2x128x384xbf16, #tpu.memory_space<vmem>>, vector<1x128x384xbf16>
    %157 = vector.shape_cast %156 : vector<1x128x384xbf16> to vector<128x384xbf16>
    %cst_78 = arith.constant dense<0.000000e+00> : vector<8x384xf32>
    %158 = tpu.matmul %155, %157, %cst_78 {dimension_numbers = #tpu.dot_dimension_numbers<[1], [0], [0], [1], [0, 0, 1, 1], [], []>} : vector<8x128xbf16>, vector<128x384xbf16>, vector<8x384xf32> -> vector<8x384xf32>
    %c1_79 = arith.constant 1 : index
    %c0_80 = arith.constant 0 : index
    %c0_81 = arith.constant 0 : index
    %159 = vector.load %arg4[%c1_79, %c0_80, %c0_81] : memref<2x1x384xf32, #tpu.memory_space<vmem>>, vector<1x1x384xf32>
    %160 = vector.shape_cast %159 : vector<1x1x384xf32> to vector<1x384xf32>
    %161 = vector.broadcast %160 : vector<1x384xf32> to vector<8x384xf32>
    %162 = arith.addf %158, %161 : vector<8x384xf32>
    %163 = vector.extract_strided_slice %162 {offsets = [0, 0], sizes = [8, 64], strides = [1, 1]} : vector<8x384xf32> to vector<8x64xf32>
    %164 = vector.shape_cast %163 : vector<8x64xf32> to vector<1x8x64xf32>
    %165 = vector.extract_strided_slice %162 {offsets = [0, 128], sizes = [8, 64], strides = [1, 1]} : vector<8x384xf32> to vector<8x64xf32>
    %166 = vector.shape_cast %165 : vector<8x64xf32> to vector<1x8x64xf32>
    %167 = vector.extract_strided_slice %162 {offsets = [0, 256], sizes = [8, 64], strides = [1, 1]} : vector<8x384xf32> to vector<8x64xf32>
    %168 = vector.shape_cast %167 : vector<8x64xf32> to vector<1x8x64xf32>
    %169 = arith.truncf %164 : vector<1x8x64xf32> to vector<1x8x64xbf16>
    %170 = arith.truncf %166 : vector<1x8x64xf32> to vector<1x8x64xbf16>
    "tpu.trace_start"() <{level = 10 : i32, message = "bsd,btd->bst"}> : () -> ()
    %cst_82 = arith.constant dense<0.000000e+00> : vector<1x8x8xf32>
    %171 = tpu.matmul %169, %170, %cst_82 {dimension_numbers = #tpu.dot_dimension_numbers<[2], [2], [1], [1], [0, 0, 0, 1, 1, 1], [0], [0]>} : vector<1x8x64xbf16>, vector<1x8x64xbf16>, vector<1x8x8xf32> -> vector<1x8x8xf32>
    "tpu.trace_stop"() : () -> ()
    %cst_83 = arith.constant 2.500000e-01 : f32
    %172 = vector.broadcast %cst_83 : f32 to vector<1x8x8xf32>
    %173 = arith.mulf %171, %172 : vector<1x8x8xf32>
    %174 = arith.addf %173, %154 : vector<1x8x8xf32>
    %cst_84 = arith.constant dense<0xFF800000> : vector<1x8xf32>
    %175 = vector.multi_reduction <maximumf>, %174, %cst_84 [2] : vector<1x8x8xf32> to vector<1x8xf32>
    %176 = vector.shape_cast %175 : vector<1x8xf32> to vector<1x8x1xf32>
    %177 = vector.broadcast %176 : vector<1x8x1xf32> to vector<1x8x8xf32>
    %178 = arith.subf %174, %177 : vector<1x8x8xf32>
    %179 = math.exp %178 : vector<1x8x8xf32>
    %cst_85 = arith.constant dense<0.000000e+00> : vector<1x8xf32>
    %180 = vector.multi_reduction <add>, %179, %cst_85 [2] : vector<1x8x8xf32> to vector<1x8xf32>
    %181 = vector.shape_cast %180 : vector<1x8xf32> to vector<1x8x1xf32>
    %182 = tpu.reciprocal %181 {approx = true} : vector<1x8x1xf32> -> vector<1x8x1xf32>
    %183 = vector.broadcast %182 : vector<1x8x1xf32> to vector<1x8x8xf32>
    %184 = arith.mulf %179, %183 : vector<1x8x8xf32>
    %185 = arith.truncf %184 : vector<1x8x8xf32> to vector<1x8x8xbf16>
    %186 = arith.truncf %168 : vector<1x8x64xf32> to vector<1x8x64xbf16>
    "tpu.trace_start"() <{level = 10 : i32, message = "bst,btd->bsd"}> : () -> ()
    %cst_86 = arith.constant dense<0.000000e+00> : vector<1x8x64xf32>
    %187 = tpu.matmul %185, %186, %cst_86 {dimension_numbers = #tpu.dot_dimension_numbers<[2], [1], [1], [2], [0, 0, 0, 1, 1, 2], [0], [0]>} : vector<1x8x8xbf16>, vector<1x8x64xbf16>, vector<1x8x64xf32> -> vector<1x8x64xf32>
    "tpu.trace_stop"() : () -> ()
    %188 = vector.shape_cast %187 : vector<1x8x64xf32> to vector<8x64xf32>
    %189 = vector.extract_strided_slice %162 {offsets = [0, 64], sizes = [8, 64], strides = [1, 1]} : vector<8x384xf32> to vector<8x64xf32>
    %190 = vector.shape_cast %189 : vector<8x64xf32> to vector<1x8x64xf32>
    %191 = vector.extract_strided_slice %162 {offsets = [0, 192], sizes = [8, 64], strides = [1, 1]} : vector<8x384xf32> to vector<8x64xf32>
    %192 = vector.shape_cast %191 : vector<8x64xf32> to vector<1x8x64xf32>
    %193 = vector.extract_strided_slice %162 {offsets = [0, 320], sizes = [8, 64], strides = [1, 1]} : vector<8x384xf32> to vector<8x64xf32>
    %194 = vector.shape_cast %193 : vector<8x64xf32> to vector<1x8x64xf32>
    %195 = arith.truncf %190 : vector<1x8x64xf32> to vector<1x8x64xbf16>
    %196 = arith.truncf %192 : vector<1x8x64xf32> to vector<1x8x64xbf16>
    "tpu.trace_start"() <{level = 10 : i32, message = "bsd,btd->bst"}> : () -> ()
    %cst_87 = arith.constant dense<0.000000e+00> : vector<1x8x8xf32>
    %197 = tpu.matmul %195, %196, %cst_87 {dimension_numbers = #tpu.dot_dimension_numbers<[2], [2], [1], [1], [0, 0, 0, 1, 1, 1], [0], [0]>} : vector<1x8x64xbf16>, vector<1x8x64xbf16>, vector<1x8x8xf32> -> vector<1x8x8xf32>
    "tpu.trace_stop"() : () -> ()
    %cst_88 = arith.constant 2.500000e-01 : f32
    %198 = vector.broadcast %cst_88 : f32 to vector<1x8x8xf32>
    %199 = arith.mulf %197, %198 : vector<1x8x8xf32>
    %200 = arith.addf %199, %154 : vector<1x8x8xf32>
    %cst_89 = arith.constant dense<0xFF800000> : vector<1x8xf32>
    %201 = vector.multi_reduction <maximumf>, %200, %cst_89 [2] : vector<1x8x8xf32> to vector<1x8xf32>
    %202 = vector.shape_cast %201 : vector<1x8xf32> to vector<1x8x1xf32>
    %203 = vector.broadcast %202 : vector<1x8x1xf32> to vector<1x8x8xf32>
    %204 = arith.subf %200, %203 : vector<1x8x8xf32>
    %205 = math.exp %204 : vector<1x8x8xf32>
    %cst_90 = arith.constant dense<0.000000e+00> : vector<1x8xf32>
    %206 = vector.multi_reduction <add>, %205, %cst_90 [2] : vector<1x8x8xf32> to vector<1x8xf32>
    %207 = vector.shape_cast %206 : vector<1x8xf32> to vector<1x8x1xf32>
    %208 = tpu.reciprocal %207 {approx = true} : vector<1x8x1xf32> -> vector<1x8x1xf32>
    %209 = vector.broadcast %208 : vector<1x8x1xf32> to vector<1x8x8xf32>
    %210 = arith.mulf %205, %209 : vector<1x8x8xf32>
    %211 = arith.truncf %210 : vector<1x8x8xf32> to vector<1x8x8xbf16>
    %212 = arith.truncf %194 : vector<1x8x64xf32> to vector<1x8x64xbf16>
    "tpu.trace_start"() <{level = 10 : i32, message = "bst,btd->bsd"}> : () -> ()
    %cst_91 = arith.constant dense<0.000000e+00> : vector<1x8x64xf32>
    %213 = tpu.matmul %211, %212, %cst_91 {dimension_numbers = #tpu.dot_dimension_numbers<[2], [1], [1], [2], [0, 0, 0, 1, 1, 2], [0], [0]>} : vector<1x8x8xbf16>, vector<1x8x64xbf16>, vector<1x8x64xf32> -> vector<1x8x64xf32>
    "tpu.trace_stop"() : () -> ()
    %214 = vector.shape_cast %213 : vector<1x8x64xf32> to vector<8x64xf32>
    %215 = tpu.concatenate %188, %214 in 1 : vector<8x64xf32>, vector<8x64xf32> -> vector<8x128xf32>
    %216 = arith.truncf %215 : vector<8x128xf32> to vector<8x128xbf16>
    %c1_92 = arith.constant 1 : index
    %c0_93 = arith.constant 0 : index
    %c0_94 = arith.constant 0 : index
    %217 = vector.load %arg5[%c1_92, %c0_93, %c0_94] : memref<2x128x128xbf16, #tpu.memory_space<vmem>>, vector<1x128x128xbf16>
    %218 = vector.shape_cast %217 : vector<1x128x128xbf16> to vector<128x128xbf16>
    %cst_95 = arith.constant dense<0.000000e+00> : vector<8x128xf32>
    %219 = tpu.matmul %216, %218, %cst_95 {dimension_numbers = #tpu.dot_dimension_numbers<[1], [0], [0], [1], [0, 0, 1, 1], [], []>} : vector<8x128xbf16>, vector<128x128xbf16>, vector<8x128xf32> -> vector<8x128xf32>
    %c1_96 = arith.constant 1 : index
    %c0_97 = arith.constant 0 : index
    %c0_98 = arith.constant 0 : index
    %220 = vector.load %arg6[%c1_96, %c0_97, %c0_98] : memref<2x1x128xf32, #tpu.memory_space<vmem>>, vector<1x1x128xf32>
    %221 = vector.shape_cast %220 : vector<1x1x128xf32> to vector<1x128xf32>
    %222 = vector.broadcast %221 : vector<1x128xf32> to vector<8x128xf32>
    %223 = arith.addf %219, %222 : vector<8x128xf32>
    %224 = arith.addf %153, %223 : vector<8x128xf32>
    %c1_99 = arith.constant 1 : index
    %c0_100 = arith.constant 0 : index
    %c0_101 = arith.constant 0 : index
    %225 = vector.load %arg11[%c1_99, %c0_100, %c0_101] : memref<2x1x128xf32, #tpu.memory_space<vmem>>, vector<1x1x128xf32>
    %226 = vector.shape_cast %225 : vector<1x1x128xf32> to vector<1x128xf32>
    %c1_102 = arith.constant 1 : index
    %c0_103 = arith.constant 0 : index
    %c0_104 = arith.constant 0 : index
    %227 = vector.load %arg12[%c1_102, %c0_103, %c0_104] : memref<2x1x128xf32, #tpu.memory_space<vmem>>, vector<1x1x128xf32>
    %228 = vector.shape_cast %227 : vector<1x1x128xf32> to vector<1x128xf32>
    %cst_105 = arith.constant dense<0.000000e+00> : vector<8xf32>
    %229 = vector.multi_reduction <add>, %224, %cst_105 [1] : vector<8x128xf32> to vector<8xf32>
    %230 = vector.shape_cast %229 : vector<8xf32> to vector<8x1xf32>
    %cst_106 = arith.constant 3.125000e-02 : f32
    %231 = vector.broadcast %cst_106 : f32 to vector<8x1xf32>
    %232 = arith.mulf %230, %231 : vector<8x1xf32>
    %233 = arith.mulf %224, %224 : vector<8x128xf32>
    %cst_107 = arith.constant dense<0.000000e+00> : vector<8xf32>
    %234 = vector.multi_reduction <add>, %233, %cst_107 [1] : vector<8x128xf32> to vector<8xf32>
    %235 = vector.shape_cast %234 : vector<8xf32> to vector<8x1xf32>
    %cst_108 = arith.constant 3.125000e-02 : f32
    %236 = vector.broadcast %cst_108 : f32 to vector<8x1xf32>
    %237 = arith.mulf %235, %236 : vector<8x1xf32>
    %238 = arith.mulf %232, %232 : vector<8x1xf32>
    %239 = arith.subf %237, %238 : vector<8x1xf32>
    %240 = vector.broadcast %232 : vector<8x1xf32> to vector<8x128xf32>
    %241 = arith.subf %224, %240 : vector<8x128xf32>
    %cst_109 = arith.constant 9.99999974E-6 : f32
    %242 = vector.broadcast %cst_109 : f32 to vector<8x1xf32>
    %243 = arith.addf %239, %242 : vector<8x1xf32>
    %244 = math.rsqrt %243 : vector<8x1xf32>
    %245 = vector.broadcast %244 : vector<8x1xf32> to vector<8x128xf32>
    %246 = arith.mulf %241, %245 : vector<8x128xf32>
    %247 = vector.broadcast %226 : vector<1x128xf32> to vector<8x128xf32>
    %248 = arith.mulf %246, %247 : vector<8x128xf32>
    %249 = vector.broadcast %228 : vector<1x128xf32> to vector<8x128xf32>
    %250 = arith.addf %248, %249 : vector<8x128xf32>
    %251 = arith.truncf %250 : vector<8x128xf32> to vector<8x128xbf16>
    %c1_110 = arith.constant 1 : index
    %c0_111 = arith.constant 0 : index
    %c0_112 = arith.constant 0 : index
    %252 = vector.load %arg7[%c1_110, %c0_111, %c0_112] : memref<2x128x128xbf16, #tpu.memory_space<vmem>>, vector<1x128x128xbf16>
    %253 = vector.shape_cast %252 : vector<1x128x128xbf16> to vector<128x128xbf16>
    %cst_113 = arith.constant dense<0.000000e+00> : vector<8x128xf32>
    %254 = tpu.matmul %251, %253, %cst_113 {dimension_numbers = #tpu.dot_dimension_numbers<[1], [0], [0], [1], [0, 0, 1, 1], [], []>} : vector<8x128xbf16>, vector<128x128xbf16>, vector<8x128xf32> -> vector<8x128xf32>
    %c1_114 = arith.constant 1 : index
    %c0_115 = arith.constant 0 : index
    %c0_116 = arith.constant 0 : index
    %255 = vector.load %arg8[%c1_114, %c0_115, %c0_116] : memref<2x1x128xf32, #tpu.memory_space<vmem>>, vector<1x1x128xf32>
    %256 = vector.shape_cast %255 : vector<1x1x128xf32> to vector<1x128xf32>
    %257 = vector.broadcast %256 : vector<1x128xf32> to vector<8x128xf32>
    %258 = arith.addf %254, %257 : vector<8x128xf32>
    %cst_117 = arith.constant 0.000000e+00 : f32
    %259 = vector.broadcast %cst_117 : f32 to vector<8x128xf32>
    %260 = arith.maximumf %258, %259 : vector<8x128xf32>
    %261 = arith.truncf %260 : vector<8x128xf32> to vector<8x128xbf16>
    %c1_118 = arith.constant 1 : index
    %c0_119 = arith.constant 0 : index
    %c0_120 = arith.constant 0 : index
    %262 = vector.load %arg9[%c1_118, %c0_119, %c0_120] : memref<2x128x128xbf16, #tpu.memory_space<vmem>>, vector<1x128x128xbf16>
    %263 = vector.shape_cast %262 : vector<1x128x128xbf16> to vector<128x128xbf16>
    %cst_121 = arith.constant dense<0.000000e+00> : vector<8x128xf32>
    %264 = tpu.matmul %261, %263, %cst_121 {dimension_numbers = #tpu.dot_dimension_numbers<[1], [0], [0], [1], [0, 0, 1, 1], [], []>} : vector<8x128xbf16>, vector<128x128xbf16>, vector<8x128xf32> -> vector<8x128xf32>
    %c1_122 = arith.constant 1 : index
    %c0_123 = arith.constant 0 : index
    %c0_124 = arith.constant 0 : index
    %265 = vector.load %arg10[%c1_122, %c0_123, %c0_124] : memref<2x1x128xf32, #tpu.memory_space<vmem>>, vector<1x1x128xf32>
    %266 = vector.shape_cast %265 : vector<1x1x128xf32> to vector<1x128xf32>
    %267 = vector.broadcast %266 : vector<1x128xf32> to vector<8x128xf32>
    %268 = arith.addf %264, %267 : vector<8x128xf32>
    %269 = arith.addf %250, %268 : vector<8x128xf32>
    %c1_125 = arith.constant 1 : index
    %c0_126 = arith.constant 0 : index
    %c0_127 = arith.constant 0 : index
    %270 = vector.load %arg13[%c1_125, %c0_126, %c0_127] : memref<2x1x128xf32, #tpu.memory_space<vmem>>, vector<1x1x128xf32>
    %271 = vector.shape_cast %270 : vector<1x1x128xf32> to vector<1x128xf32>
    %c1_128 = arith.constant 1 : index
    %c0_129 = arith.constant 0 : index
    %c0_130 = arith.constant 0 : index
    %272 = vector.load %arg14[%c1_128, %c0_129, %c0_130] : memref<2x1x128xf32, #tpu.memory_space<vmem>>, vector<1x1x128xf32>
    %273 = vector.shape_cast %272 : vector<1x1x128xf32> to vector<1x128xf32>
    %cst_131 = arith.constant dense<0.000000e+00> : vector<8xf32>
    %274 = vector.multi_reduction <add>, %269, %cst_131 [1] : vector<8x128xf32> to vector<8xf32>
    %275 = vector.shape_cast %274 : vector<8xf32> to vector<8x1xf32>
    %cst_132 = arith.constant 3.125000e-02 : f32
    %276 = vector.broadcast %cst_132 : f32 to vector<8x1xf32>
    %277 = arith.mulf %275, %276 : vector<8x1xf32>
    %278 = arith.mulf %269, %269 : vector<8x128xf32>
    %cst_133 = arith.constant dense<0.000000e+00> : vector<8xf32>
    %279 = vector.multi_reduction <add>, %278, %cst_133 [1] : vector<8x128xf32> to vector<8xf32>
    %280 = vector.shape_cast %279 : vector<8xf32> to vector<8x1xf32>
    %cst_134 = arith.constant 3.125000e-02 : f32
    %281 = vector.broadcast %cst_134 : f32 to vector<8x1xf32>
    %282 = arith.mulf %280, %281 : vector<8x1xf32>
    %283 = arith.mulf %277, %277 : vector<8x1xf32>
    %284 = arith.subf %282, %283 : vector<8x1xf32>
    %285 = vector.broadcast %277 : vector<8x1xf32> to vector<8x128xf32>
    %286 = arith.subf %269, %285 : vector<8x128xf32>
    %cst_135 = arith.constant 9.99999974E-6 : f32
    %287 = vector.broadcast %cst_135 : f32 to vector<8x1xf32>
    %288 = arith.addf %284, %287 : vector<8x1xf32>
    %289 = math.rsqrt %288 : vector<8x1xf32>
    %290 = vector.broadcast %289 : vector<8x1xf32> to vector<8x128xf32>
    %291 = arith.mulf %286, %290 : vector<8x128xf32>
    %292 = vector.broadcast %271 : vector<1x128xf32> to vector<8x128xf32>
    %293 = arith.mulf %291, %292 : vector<8x128xf32>
    %294 = vector.broadcast %273 : vector<1x128xf32> to vector<8x128xf32>
    %295 = arith.addf %293, %294 : vector<8x128xf32>
    %c0_136 = arith.constant 0 : index
    %c0_137 = arith.constant 0 : index
    %296 = vector.load %arg15[%c0_136, %c0_137] : memref<1x128xf32, #tpu.memory_space<vmem>>, vector<1x128xf32>
    %c0_138 = arith.constant 0 : index
    %c0_139 = arith.constant 0 : index
    %297 = vector.load %arg16[%c0_138, %c0_139] : memref<1x128xf32, #tpu.memory_space<vmem>>, vector<1x128xf32>
    %cst_140 = arith.constant dense<0.000000e+00> : vector<8xf32>
    %298 = vector.multi_reduction <add>, %295, %cst_140 [1] : vector<8x128xf32> to vector<8xf32>
    %299 = vector.shape_cast %298 : vector<8xf32> to vector<8x1xf32>
    %cst_141 = arith.constant 3.125000e-02 : f32
    %300 = vector.broadcast %cst_141 : f32 to vector<8x1xf32>
    %301 = arith.mulf %299, %300 : vector<8x1xf32>
    %302 = arith.mulf %295, %295 : vector<8x128xf32>
    %cst_142 = arith.constant dense<0.000000e+00> : vector<8xf32>
    %303 = vector.multi_reduction <add>, %302, %cst_142 [1] : vector<8x128xf32> to vector<8xf32>
    %304 = vector.shape_cast %303 : vector<8xf32> to vector<8x1xf32>
    %cst_143 = arith.constant 3.125000e-02 : f32
    %305 = vector.broadcast %cst_143 : f32 to vector<8x1xf32>
    %306 = arith.mulf %304, %305 : vector<8x1xf32>
    %307 = arith.mulf %301, %301 : vector<8x1xf32>
    %308 = arith.subf %306, %307 : vector<8x1xf32>
    %309 = vector.broadcast %301 : vector<8x1xf32> to vector<8x128xf32>
    %310 = arith.subf %295, %309 : vector<8x128xf32>
    %cst_144 = arith.constant 9.99999974E-6 : f32
    %311 = vector.broadcast %cst_144 : f32 to vector<8x1xf32>
    %312 = arith.addf %308, %311 : vector<8x1xf32>
    %313 = math.rsqrt %312 : vector<8x1xf32>
    %314 = vector.broadcast %313 : vector<8x1xf32> to vector<8x128xf32>
    %315 = arith.mulf %310, %314 : vector<8x128xf32>
    %316 = vector.broadcast %296 : vector<1x128xf32> to vector<8x128xf32>
    %317 = arith.mulf %315, %316 : vector<8x128xf32>
    %318 = vector.broadcast %297 : vector<1x128xf32> to vector<8x128xf32>
    %319 = arith.addf %317, %318 : vector<8x128xf32>
    %320 = vector.shape_cast %319 : vector<8x128xf32> to vector<1x8x128xf32>
    %c0_145 = arith.constant 0 : index
    %c0_146 = arith.constant 0 : index
    %c0_147 = arith.constant 0 : index
    %321 = vector.load %arg17[%c0_145, %c0_146, %c0_147] : memref<1x8x128xf32, #tpu.memory_space<vmem>>, vector<1x8x128xf32>
    tpu.vector_store %arg17[%c0_145, %c0_146, %c0_147], %320 {strides = array<i32>} : memref<1x8x128xf32, #tpu.memory_space<vmem>>, vector<1x8x128xf32>,
    return
  }
  func.func @transform_0(%arg0: i32) -> (i32, i32, i32) {
    %c0_i32 = arith.constant 0 : i32
    %c0_i32_0 = arith.constant 0 : i32
    %c0_i32_1 = arith.constant 0 : i32
    return %arg0, %c0_i32, %c0_i32_0 : i32, i32, i32
  }
  func.func @transform_1(%arg0: i32) -> (i32, i32, i32) {
    %c0_i32 = arith.constant 0 : i32
    %c0_i32_0 = arith.constant 0 : i32
    %c0_i32_1 = arith.constant 0 : i32
    return %arg0, %c0_i32, %c0_i32_0 : i32, i32, i32
  }
  func.func @transform_2(%arg0: i32) -> (i32, i32, i32) {
    %c0_i32 = arith.constant 0 : i32
    %c0_i32_0 = arith.constant 0 : i32
    %c0_i32_1 = arith.constant 0 : i32
    %c0_i32_2 = arith.constant 0 : i32
    return %c0_i32, %c0_i32_0, %c0_i32_1 : i32, i32, i32
  }
  func.func @transform_3(%arg0: i32) -> (i32, i32, i32) {
    %c0_i32 = arith.constant 0 : i32
    %c0_i32_0 = arith.constant 0 : i32
    %c0_i32_1 = arith.constant 0 : i32
    %c0_i32_2 = arith.constant 0 : i32
    return %c0_i32, %c0_i32_0, %c0_i32_1 : i32, i32, i32
  }
  func.func @transform_4(%arg0: i32) -> (i32, i32, i32) {
    %c0_i32 = arith.constant 0 : i32
    %c0_i32_0 = arith.constant 0 : i32
    %c0_i32_1 = arith.constant 0 : i32
    %c0_i32_2 = arith.constant 0 : i32
    return %c0_i32, %c0_i32_0, %c0_i32_1 : i32, i32, i32
  }
  func.func @transform_5(%arg0: i32) -> (i32, i32, i32) {
    %c0_i32 = arith.constant 0 : i32
    %c0_i32_0 = arith.constant 0 : i32
    %c0_i32_1 = arith.constant 0 : i32
    %c0_i32_2 = arith.constant 0 : i32
    return %c0_i32, %c0_i32_0, %c0_i32_1 : i32, i32, i32
  }
  func.func @transform_6(%arg0: i32) -> (i32, i32, i32) {
    %c0_i32 = arith.constant 0 : i32
    %c0_i32_0 = arith.constant 0 : i32
    %c0_i32_1 = arith.constant 0 : i32
    %c0_i32_2 = arith.constant 0 : i32
    return %c0_i32, %c0_i32_0, %c0_i32_1 : i32, i32, i32
  }
  func.func @transform_7(%arg0: i32) -> (i32, i32, i32) {
    %c0_i32 = arith.constant 0 : i32
    %c0_i32_0 = arith.constant 0 : i32
    %c0_i32_1 = arith.constant 0 : i32
    %c0_i32_2 = arith.constant 0 : i32
    return %c0_i32, %c0_i32_0, %c0_i32_1 : i32, i32, i32
  }
  func.func @transform_8(%arg0: i32) -> (i32, i32, i32) {
    %c0_i32 = arith.constant 0 : i32
    %c0_i32_0 = arith.constant 0 : i32
    %c0_i32_1 = arith.constant 0 : i32
    %c0_i32_2 = arith.constant 0 : i32
    return %c0_i32, %c0_i32_0, %c0_i32_1 : i32, i32, i32
  }
  func.func @transform_9(%arg0: i32) -> (i32, i32, i32) {
    %c0_i32 = arith.constant 0 : i32
    %c0_i32_0 = arith.constant 0 : i32
    %c0_i32_1 = arith.constant 0 : i32
    %c0_i32_2 = arith.constant 0 : i32
    return %c0_i32, %c0_i32_0, %c0_i32_1 : i32, i32, i32
  }
  func.func @transform_10(%arg0: i32) -> (i32, i32, i32) {
    %c0_i32 = arith.constant 0 : i32
    %c0_i32_0 = arith.constant 0 : i32
    %c0_i32_1 = arith.constant 0 : i32
    %c0_i32_2 = arith.constant 0 : i32
    return %c0_i32, %c0_i32_0, %c0_i32_1 : i32, i32, i32
  }
  func.func @transform_11(%arg0: i32) -> (i32, i32, i32) {
    %c0_i32 = arith.constant 0 : i32
    %c0_i32_0 = arith.constant 0 : i32
    %c0_i32_1 = arith.constant 0 : i32
    %c0_i32_2 = arith.constant 0 : i32
    return %c0_i32, %c0_i32_0, %c0_i32_1 : i32, i32, i32
  }
  func.func @transform_12(%arg0: i32) -> (i32, i32, i32) {
    %c0_i32 = arith.constant 0 : i32
    %c0_i32_0 = arith.constant 0 : i32
    %c0_i32_1 = arith.constant 0 : i32
    %c0_i32_2 = arith.constant 0 : i32
    return %c0_i32, %c0_i32_0, %c0_i32_1 : i32, i32, i32
  }
  func.func @transform_13(%arg0: i32) -> (i32, i32, i32) {
    %c0_i32 = arith.constant 0 : i32
    %c0_i32_0 = arith.constant 0 : i32
    %c0_i32_1 = arith.constant 0 : i32
    %c0_i32_2 = arith.constant 0 : i32
    return %c0_i32, %c0_i32_0, %c0_i32_1 : i32, i32, i32
  }
  func.func @transform_14(%arg0: i32) -> (i32, i32) {
    %c0_i32 = arith.constant 0 : i32
    %c0_i32_0 = arith.constant 0 : i32
    %c0_i32_1 = arith.constant 0 : i32
    return %c0_i32, %c0_i32_0 : i32, i32
  }
  func.func @transform_15(%arg0: i32) -> (i32, i32) {
    %c0_i32 = arith.constant 0 : i32
    %c0_i32_0 = arith.constant 0 : i32
    %c0_i32_1 = arith.constant 0 : i32
    return %c0_i32, %c0_i32_0 : i32, i32
  }
  func.func @transform_16(%arg0: i32) -> (i32, i32, i32) {
    %c0_i32 = arith.constant 0 : i32
    %c0_i32_0 = arith.constant 0 : i32
    %c0_i32_1 = arith.constant 0 : i32
    return %arg0, %c0_i32, %c0_i32_0 : i32, i32, i32
  }
}

</mosaic_0001>

<bundles_post_ra>
// kernel: tpu_custom_call.1
= control target key start
LH: loop header
LB: loop body
LE: loop exit
PB: predicated region body
PF: predicated region fallthrough
CT: control target
= control target key end

     0   :  { %s4103_s0 = inlined_call_operand.hbm [shape: f32[2,8,128], index: 0, kind: input, shape index: {}]   ;;  %s4104_s1 = inlined_call_operand.vmem [shape: f32[2,1,8], index: 1, kind: input, shape index: {}]   ;;  %s4105_s2 = inlined_call_operand.hbm [shape: bf16[2,128,384], index: 2, kind: input, shape index: {}]   ;;  %s4106_s3 = inlined_call_operand.vmem [shape: f32[2,1,384], index: 3, kind: input, shape index: {}]   ;;  %s4107_s4 = inlined_call_operand.hbm [shape: bf16[2,128,128], index: 4, kind: input, shape index: {}]   ;;  %s4108_s5 = inlined_call_operand.vmem [shape: f32[2,1,128], index: 5, kind: input, shape index: {}]   ;;  %s4109_s6 = inlined_call_operand.hbm [shape: bf16[2,128,128], index: 6, kind: input, shape index: {}]   ;;  %s4110_s7 = inlined_call_operand.vmem [shape: f32[2,1,128], index: 7, kind: input, shape index: {}]   ;;  %s4111_s8 = inlined_call_operand.hbm [shape: bf16[2,128,128], index: 8, kind: input, shape index: {}]   ;;  %s4112_s9 = inlined_call_operand.vmem [shape: f32[2,1,128], index: 9, kind: input, shape index: {}]   ;;  %s4113_s10 = inlined_call_operand.vmem [shape: f32[2,1,128], index: 10, kind: input, shape index: {}]   ;;  %s4114_s11 = inlined_call_operand.vmem [shape: f32[2,1,128], index: 11, kind: input, shape index: {}]   ;;  %s4115_s12 = inlined_call_operand.vmem [shape: f32[2,1,128], index: 12, kind: input, shape index: {}]   ;;  %s4116_s13 = inlined_call_operand.vmem [shape: f32[2,1,128], index: 13, kind: input, shape index: {}]   ;;  %s4117_s14 = inlined_call_operand.vmem [shape: f32[1,128], index: 14, kind: input, shape index: {}]   ;;  %s4118_s15 = inlined_call_operand.vmem [shape: f32[1,128], index: 15, kind: input, shape index: {}]   ;;  %s4119_s16 = inlined_call_operand.hbm [shape: f32[2,8,128], index: 16, kind: output, shape index: {}]  }
   0x1   :  { %4130 = sst [smem:[#allocation17_spill]] %s4103_s0 }
   0x2   :  { %4131 = sst [smem:[#allocation18_spill]] %s4104_s1 }
   0x3   :  { %4132 = sst [smem:[#allocation19_spill]] %s4105_s2 }
   0x4   :  { %4133 = sst [smem:[#allocation20_spill]] %s4106_s3 }
   0x5   :  { %4134 = sst [smem:[#allocation21_spill]] %s4107_s4 }
   0x6   :  { %4135 = sst [smem:[#allocation22_spill]] %s4108_s5 }
   0x7   :  { %4136 = sst [smem:[#allocation23_spill]] %s4109_s6 }
   0x8   :  { %4137 = sst [smem:[#allocation24_spill]] %s4110_s7 }
   0x9   :  { %4138 = sst [smem:[#allocation25_spill]] %s4112_s9 }
   0xa   :  { %4139 = sst [smem:[#allocation26_spill]] %s4115_s12 }
   0xb   :  { %4140 = sst [smem:[#allocation27_spill]] %s4116_s13 }
   0xc   :  { %4141 = sst [smem:[#allocation28_spill]] %s4117_s14 }
   0xd   :  { %4142 = sst [smem:[#allocation29_spill]] %s4118_s15 }
   0xe   :  { %4143 = sst [smem:[#allocation30_spill]] %s4119_s16 }
   0xf   :  { %21 = vsyncpa [#allocation4], 0 }
  0x10   :  { %23 = vsyncpa [#allocation4 + $0x1], 0 }
  0x11   :  { %24 = vsyncpa [#allocation7], 0 }
  0x12   :  { %25 = vsyncpa [#allocation10], 0 }
  0x13   :  { %26 = vsyncpa [#allocation5], 0 }
  0x14   :  { %28 = vsyncpa [#allocation5 + $0x1], 0  ;;  %s3571_s21 = smov 0   ;;  %s3573_s22 = smov 0  }
  0x15   :  { %s3575_s23 = smov 0   ;;  %s3577_s24 = smov 0  }
  0x16 LB: > { %s3471_s25 = smov [#allocation6]   ;;  %s3592_s27 = sadd.s32 4294967295, %s3469_s24   ;;  %s3469_s24 = sphi %s3577_s24, %s4178_s24   ;;  %s3465_s23 = sphi %s3575_s23, %s4177_s23   ;;  %s3461_s22 = sphi %s3573_s22, %s4176_s22   ;;  %s3457_s21 = sphi %s3571_s21, %s4175_s21  }
  0x17   : > { %s423_s26 = sshll.u32 %s3471_s25, 4  ;;  %p2575_p0 = scmp.ge.s32.totalorder %s3469_s24, 1  ;;  %s3597_s26 = int_to_ptr.vmem [resolvable:$true] %s423_s26 }
  0x18   : > { %p4126_p1 = scmp.eq.s32.totalorder %s3592_s27, 0  ;;  %p411_p2 = scmp.lt.s32.totalorder %s3469_s24, 3 }
  0x19   : > { %s3472_s30 = smov [#allocation9]   ;;  %s3473_s17 = smov [#allocation8]  }
  0x1a   : > { %p3599_p3 = pnand %p2575_p0, %p411_p2  ;;  %s455_s0 = sshll.u32 %s3472_s30, 4  ;;  %s3612_s0 = int_to_ptr.vmem [resolvable:$true] %s455_s0 }
  0x1b   : > { %s3614_s18 = sshll.u32 %s3473_s17, 4  ;;  %s4146_s2 = sld [smem:[#allocation19_spill]]  ;;  %s440_s18 = int_to_ptr.vmem [resolvable:$true] %s3614_s18 }
  0x1c   : > { %s4144_s28 = scalar_select %p3599_p3, 1, 0 }
  0x1d   : > { %p3039_p5 = pneg %p3599_p3 }
  0x1f   : > { %p3608_p6 = pnand %p3039_p5, %p4126_p1 }
  0x21   : > { %s3253_s25 = scalar_lea.hbm %s4146_s2, 6144  ;;  %p3624_p8 = pneg %p3608_p6 }
  0x22   : > { %p3254_p7 = scmp.ne.s32.totalorder %s4146_s2, %s3253_s25  ;;  %p3260_p11 = scmp.lt.u32.totalorder %s3253_s25, %s4146_s2 }
  0x24   : > { %p3256_p9 = pnand %p3624_p8, %p3254_p7 }
  0x26   : > { %p3257_p10 = pneg %p3256_p9 }
  0x28   : > { %p3262_p12 = pnand %p3260_p11, %p3257_p10 }
  0x2a   : > { %3265 = shalt.err (!%p3262_p12)
}
  0x2b   : > { %s3266_s15 = scalar_lea.vmem %s3597_s26, 6144  ;;  %p3274_p5 = scmp.lt.s32.totalorder %s3597_s26, %s3597_s26 }
  0x2c   : > { %p3267_p13 = scmp.ne.s32.totalorder %s3597_s26, %s3266_s15  ;;  %p3275_p4 = scmp.lt.s32.totalorder %s3266_s15, %s3266_s15 }
  0x2e   : > { %p3269_p0 = pnand %p3267_p13, %p3624_p8  ;;  %p3276_p7 = por %p3275_p4, %p3274_p5 }
  0x30   : > { %p3270_p2 = pneg %p3269_p0 }
  0x32   : > { %p3277_p9 = pnand %p3276_p7, %p3270_p2 }
  0x34   : > { %3280 = shalt.err (!%p3277_p9)
}
  0x35   : > { %s3474_s16 = smov 192   ;;  %s3475_s19 = smov 12  }
  0x36   : > { %3042 = dma.hbm_to_vmem [thread:$0]  (!%p3608_p6), %s4146_s2, 6144, %s3597_s26, [#allocation7], %s3474_s16, %s3474_s16, %s3475_s19  }
  0x37   : > { %s4148_s6 = sld [smem:[#allocation23_spill]] }
  0x3d   : > { %s3281_s13 = scalar_lea.hbm %s4148_s6, 2048 }
  0x3e   : > { %p3282_p4 = scmp.ne.s32.totalorder %s4148_s6, %s3281_s13  ;;  %p3288_p12 = scmp.lt.u32.totalorder %s3281_s13, %s4148_s6 }
  0x40   : > { %p3284_p10 = pnand %p3282_p4, %p3624_p8 }
  0x42   : > { %p3285_p11 = pneg %p3284_p10 }
  0x44   : > { %p3290_p13 = pnand %p3288_p12, %p3285_p11 }
  0x46   : > { %3293 = shalt.err (!%p3290_p13)
}
  0x47   : > { %s3294_s26 = scalar_lea.vmem %s3612_s0, 2048  ;;  %p3302_p7 = scmp.lt.s32.totalorder %s3612_s0, %s3612_s0 }
  0x48   : > { %p3295_p0 = scmp.ne.s32.totalorder %s3612_s0, %s3294_s26  ;;  %p3303_p9 = scmp.lt.s32.totalorder %s3294_s26, %s3294_s26 }
  0x4a   : > { %p3297_p2 = pnand %p3295_p0, %p3624_p8  ;;  %p3304_p4 = por %p3303_p9, %p3302_p7 }
  0x4c   : > { %p3298_p5 = pneg %p3297_p2 }
  0x4e   : > { %p3305_p10 = pnand %p3304_p4, %p3298_p5 }
  0x50   : > { %3308 = shalt.err (!%p3305_p10)
}
  0x51   : > { %s3476_s9 = smov 64   ;;  %s3477_s7 = smov 4  }
  0x52   : > { %3048 = dma.hbm_to_vmem [thread:$0]  (!%p3608_p6), %s4148_s6, 2048, %s3612_s0, [#allocation10], %s3476_s9, %s3476_s9, %s3477_s7  }
  0x53   : > { %s4149_s4 = sld [smem:[#allocation21_spill]] }
  0x59   : > { %s3309_s20 = scalar_lea.hbm %s4149_s4, 2048 }
  0x5a   : > { %p3310_p11 = scmp.ne.s32.totalorder %s4149_s4, %s3309_s20  ;;  %p3316_p0 = scmp.lt.u32.totalorder %s3309_s20, %s4149_s4 }
  0x5c   : > { %p3312_p12 = pnand %p3310_p11, %p3624_p8 }
  0x5e   : > { %p3313_p13 = pneg %p3312_p12 }
  0x60   : > { %p3318_p2 = pnand %p3316_p0, %p3313_p13 }
  0x62   : > { %3321 = shalt.err (!%p3318_p2)
}
  0x63   : > { %s3322_s26 = scalar_lea.vmem %s440_s18, 2048  ;;  %p3330_p4 = scmp.lt.s32.totalorder %s440_s18, %s440_s18 }
  0x64   : > { %p3323_p5 = scmp.ne.s32.totalorder %s440_s18, %s3322_s26  ;;  %p3331_p10 = scmp.lt.s32.totalorder %s3322_s26, %s3322_s26 }
  0x66   : > { %p3325_p7 = pnand %p3323_p5, %p3624_p8  ;;  %p3332_p1 = por %p3331_p10, %p3330_p4 }
  0x68   : > { %p3326_p9 = pneg %p3325_p7 }
  0x6a   : > { %p3333_p3 = pnand %p3332_p1, %p3326_p9 }
  0x6c   : > { %3336 = shalt.err (!%p3333_p3)
}
  0x6d   : > { %3045 = dma.hbm_to_vmem [thread:$0]  (!%p3608_p6), %s4149_s4, 2048, %s440_s18, [#allocation7], %s3476_s9, %s3476_s9, %s3477_s7  }
  0x6e   : > { %s3478_s13 = smov [#allocation11]   ;;  %s3337_s25 = scalar_lea.hbm %s4111_s8, 2048 }
  0x6f   : > { %s471_s16 = sshll.u32 %s3478_s13, 4  ;;  %p3338_p1 = scmp.ne.s32.totalorder %s4111_s8, %s3337_s25  ;;  %s472_s16 = int_to_ptr.vmem [resolvable:$true] %s471_s16 }
  0x70   : > { %p3344_p12 = scmp.lt.u32.totalorder %s3337_s25, %s4111_s8 }
  0x71   : > { %p3340_p3 = pnand %p3338_p1, %p3624_p8 }
  0x73   : > { %p3341_p11 = pneg %p3340_p3 }
  0x75   : > { %p3346_p13 = pnand %p3344_p12, %p3341_p11 }
  0x77   : > { %3349 = shalt.err (!%p3346_p13)
}
  0x78   : > { %s3350_s18 = scalar_lea.vmem %s472_s16, 2048  ;;  %p3358_p7 = scmp.lt.s32.totalorder %s472_s16, %s472_s16 }
  0x79   : > { %p3351_p0 = scmp.ne.s32.totalorder %s472_s16, %s3350_s18  ;;  %p3359_p9 = scmp.lt.s32.totalorder %s3350_s18, %s3350_s18 }
  0x7b   : > { %p3353_p2 = pnand %p3351_p0, %p3624_p8  ;;  %p3360_p4 = por %p3359_p9, %p3358_p7 }
  0x7d   : > { %p3354_p5 = pneg %p3353_p2 }
  0x7f   : > { %p3361_p10 = pnand %p3360_p4, %p3354_p5 }
  0x81   : > { %3364 = shalt.err (!%p3361_p10)
}
  0x82   : > { %3051 = dma.hbm_to_vmem [thread:$0]  (!%p3608_p6), %s4111_s8, 2048, %s472_s16, [#allocation10], %s3476_s9, %s3476_s9, %s3477_s7  }
  0x83   : > { %s2574_s14 = sadd.s32 4294967294, %s3469_s24   ;;  %s3716_s29 = sadd.s32 1, %s3469_s24  }
  0x84   : > { %s38_s13 = ssub.s32 %s3469_s24, %s3716_s29  ;;  %s41_s19 = sadd.s32 1, %s3465_s23 }
  0x85   : > { %p39_p8 = scmp.eq.s32.totalorder %s38_s13, 0  ;;  %p48_p1 = scmp.ne.s32.totalorder %s3465_s23, %s3461_s22 }
  0x86   : > { %p49_p3 = scmp.eq.s32.totalorder %s3469_s24, 0  ;;  %p54_p11 = scmp.ne.s32.totalorder %s3461_s22, %s3457_s21 }
  0x87   : > { %s3727_s20 = scalar_select %p39_p8, %s3465_s23, %s41_s19  }
  0x88   : > { %p3729_p12 = por %p49_p3, %p48_p1  ;;  %p4151_p13 = scmp.eq.s32.totalorder %s3592_s27, 0 }
  0x89   : > { %p398_p0 = scmp.eq.s32.totalorder %s3592_s27, 1  ;;  %p404_p2 = scmp.eq.s32.totalorder %s2574_s14, 1 }
  0x8a   : > { %p3735_p6 = por %p4151_p13, %p54_p11  ;;  %p3064_p5 = scmp.lt.s32.totalorder %s3469_s24, 2 }
  0x8b   : > { %s506_s7 = sand.u32 1, %s3465_s23   ;;  %p3742_p7 = por %p398_p0, %p48_p1 }
  0x8c   : > { %p3746_p9 = por %p404_p2, %p54_p11  ;;  %s2581_s17 = sshll.u32 %s506_s7, 3 }
  0x8d   : > { %s4153_s16 = scalar_select %p3742_p7, 1, 0 }
  0x8e   : > { %s4154_s30 = scalar_select %p3746_p9, 1, 0 }
  0x8f   : > { %s2582_s15 = sshll.u32 %s3469_s24, 7  ;;  %s4155_s0 = sld [smem:[#allocation17_spill]] }
  0x90   : > { %s510_s14 = scalar_lea.vmem [#allocation3], %s2581_s17  ;;  %p3760_p4 = pnand %p3064_p5, %p3729_p12 }
  0x91   : > { %s517_s13 = sshll.u32 %s510_s14, 4  ;;  %s507_s2 = scalar_lea.sflag [#allocation4], %s506_s7  ;;  %s3756_s13 = int_to_ptr.vmem [resolvable:$true] %s517_s13 }
  0x92   : > { %p3367_p8 = pneg %p3760_p4 }
  0x95   : > { %s3754_s12 = scalar_lea.hbm %s4155_s0, %s2582_s15  ;;  %s3370_s26 = scalar_lea.hbm %s4155_s0, 256 }
  0x96   : > { %s3365_s4 = scalar_lea.hbm %s3754_s12, 128  ;;  %p3371_p11 = scmp.lt.u32.totalorder %s3754_s12, %s4155_s0 }
  0x97   : > { %p3366_p10 = scmp.ne.s32.totalorder %s3754_s12, %s3365_s4  ;;  %p3372_p12 = scmp.lt.u32.totalorder %s3370_s26, %s3365_s4 }
  0x98   : > { %p3374_p0 = scmp.lt.u32.totalorder %s3365_s4, %s3754_s12 }
  0x99   : > { %p3368_p1 = pnand %p3367_p8, %p3366_p10  ;;  %p3373_p13 = por %p3372_p12, %p3371_p11 }
  0x9b   : > { %p3369_p3 = pneg %p3368_p1  ;;  %p3375_p2 = por %p3374_p0, %p3373_p13 }
  0x9d   : > { %p3376_p5 = pnand %p3375_p2, %p3369_p3 }
  0x9f   : > { %3379 = shalt.err (!%p3376_p5)
}
  0xa0   : > { %s3380_s7 = scalar_lea.vmem %s3756_s13, 128  ;;  %s3479_s14 = smov [#allocation3]  }
  0xa1   : > { %p3381_p10 = scmp.ne.s32.totalorder %s3756_s13, %s3380_s7  ;;  %s3385_s17 = sshll.u32 %s3479_s14, 4  ;;  %s3386_s17 = int_to_ptr.vmem [resolvable:$false] %s3385_s17 }
  0xa2   : > { %s3387_s15 = scalar_lea.vmem %s3386_s17, 256  ;;  %p3388_p7 = scmp.lt.s32.totalorder %s3756_s13, %s3386_s17 }
  0xa3   : > { %p3383_p1 = pnand %p3381_p10, %p3367_p8  ;;  %p3389_p11 = scmp.lt.s32.totalorder %s3387_s15, %s3380_s7 }
  0xa5   : > { %p3384_p9 = pneg %p3383_p1  ;;  %p3390_p12 = por %p3389_p11, %p3388_p7 }
  0xa7   : > { %p3391_p13 = pnand %p3390_p12, %p3384_p9 }
  0xa9   : > { %3394 = shalt.err (!%p3391_p13)
}
  0xaa   : > { %3055 = dma.hbm_to_vmem [thread:$0]  (!%p3760_p4), %s3754_s12, 128, %s3756_s13, %s507_s2  }
  0xab   : > { %p4157_p3 = scmp.ne.s32.totalorder %s4144_s28, 0 }
  0xac   : > { %s3792_s4 = sand.u32 (!%p4157_p3), 1, %s3461_s22  }
  0xad   : > { %532 = sbr.rel (%p4157_p3) target bundleno = 5634 (0x1602), region = 84  ;;  %s2584_s26 = sshll.u32 (!%p4157_p3), %s3792_s4, 3 }
  0xae   : > { %s535_s25 = scalar_lea.sflag (!%p4157_p3), [#allocation4], %s3792_s4  ;;  %s3798_s18 = scalar_lea.vmem (!%p4157_p3), [#allocation3], %s2584_s26 }
  0xb4   : > { %3440 = dma.done.wait (%p3735_p6), %s535_s25, 128  }
  0xb5   : > { %3442 = vsyncadd (%p3735_p6), %s535_s25, 4294967168  ;;  %p4158_p7 = scmp.eq.s32.totalorder %s3592_s27, 0 }
  0xb7   : > { %3444 = dma.done.wait (%p4158_p7), [#allocation7], 8192   ;;  %p4159_p9 = pmov %p4158_p7 }
  0xb8   : > { %p4160_p4 = pmov %p4158_p7 }
  0xb9   : > { %3446 = vsyncadd (%p4159_p9), [#allocation7], 4294959104 }
  0xba   : > { %3448 = dma.done.wait (%p4160_p4), [#allocation10], 4096   ;;  %p4161_p8 = pmov %p4160_p4 }
  0xbb   : > { %v3480_v0 = vmov 0   ;;  %v3481_v1 = vmov 0.0   ;;  %v3115_v2 = vld [vmem:[#allocation6 + $0x4] ss:$12 sps:$4 sm:$0xff]   ;;  %v3117_v3 = vld [vmem:[#allocation6] ss:$12 sps:$4 sm:$0xff]   ;;  %v610_v7 = vlaneseq }
  0xbc   : > { %3450 = vsyncadd (%p4161_p8), [#allocation10], 4294963200  ;;  %838 = vmatprep.mubr.bf16.mxu0 %v3480_v0  ;;  %2811 = vmatprep.subr.bf16.mxu1 %v3481_v1  ;;  %v3118_v4 = vld [vmem:[#allocation6 + $0x1c] ss:$12 sps:$4 sm:$0xff]   ;;  %v3120_v5 = vld [vmem:[#allocation6 + $0x18] ss:$12 sps:$4 sm:$0xff]  }
  0xbd   : > { %806 = vmatprep.subr.bf16.mxu0 %v3115_v2  ;;  %v3121_v6 = vld [vmem:[#allocation6 + $0x34] ss:$12 sps:$4 sm:$0xff]   ;;  %p606_p6 = scmp.lt.s32.totalorder %s3592_s27, 1  ;;  %v3123_v8 = vld [vmem:[#allocation6 + $0x30] ss:$12 sps:$4 sm:$0xff]   ;;  %v613_v9 = vand.u32 127, %v610_v7 }
  0xbe   : > { %807 = vmatpush1.bf16.msra.mxu0 %v3117_v3  ;;  %v3124_v10 = vld [vmem:[#allocation6 + $0x4c] ss:$12 sps:$4 sm:$0xff]   ;;  %v3815_v11 = vshrl.u32 %v610_v7, 7  ;;  %v3126_v12 = vld [vmem:[#allocation6 + $0x48] ss:$12 sps:$4 sm:$0xff]   ;;  %vm624_vm1 = vcmask 64512  }
  0xbf   : > { %808 = vmatprep.subr.bf16.mxu0 %v3118_v4  ;;  %s607_s2 = scalar_select %p606_p6, %s3592_s27, 1  ;;  %v3139_v13 = vld [vmem:[#allocation6 + $0x8] ss:$12 sps:$4 sm:$0xff]   ;;  %v3127_v14 = vld [vmem:[#allocation6 + $0x64] ss:$12 sps:$4 sm:$0xff]   ;;  %vm3483_vm2 = vmmov 0  }
  0xc0   : > { %vm614_vm0 = vcmp.le.s32.totalorder %v613_v9, %v3815_v11  ;;  %2812 = vmatpush3.bf16.msra.mxu1 %v3139_v13  ;;  %v3140_v15 = vld [vmem:[#allocation6 + $0x20] ss:$12 sps:$4 sm:$0xff]   ;;  %v3482_v16 = vmov -1e+30   ;;  %v3130_v19 = vld [vmem:[#allocation6 + $0x7c] ss:$12 sps:$4 sm:$0xff]   ;;  %2827 = vmatprep.mubr.msk.bf16.mxu1 %vm3483_vm2, %v3481_v1 }
  0xc1   : > { %2813 = vmatprep.subr.bf16.mxu1 %v3481_v1  ;;  %v615_v17 = vsel %vm614_vm0, 0.0, %v3482_v16  ;;  %v3129_v18 = vld [vmem:[#allocation6 + $0x60] ss:$12 sps:$4 sm:$0xff]   ;;  %s4162_s1 = sld [smem:[#allocation18_spill]]  ;;  %v3132_v20 = vld [vmem:[#allocation6 + $0x78] ss:$12 sps:$4 sm:$0xff]  }
  0xc2   : > { %809 = vmatpush1.bf16.msra.mxu0 %v3120_v5  ;;  %v3141_v21 = vld [vmem:[#allocation6 + $0x38] ss:$12 sps:$4 sm:$0xff]   ;;  %v3133_v22 = vld [vmem:[#allocation6 + $0x94] ss:$12 sps:$4 sm:$0xff]   ;;  %v3142_v23 = vld [vmem:[#allocation6 + $0x50] ss:$12 sps:$4 sm:$0xff]  }
  0xc3   : > { %810 = vmatprep.subr.bf16.mxu0 %v3121_v6  ;;  %v3135_v26 = vld [vmem:[#allocation6 + $0x90] ss:$12 sps:$4 sm:$0xff]   ;;  %v3136_v27 = vld [vmem:[#allocation6 + $0xac] ss:$12 sps:$4 sm:$0xff]   ;;  %v3143_v28 = vld [vmem:[#allocation6 + $0x68] ss:$12 sps:$4 sm:$0xff]  }
  0xc4   : > { %2814 = vmatpush3.bf16.msra.mxu1 %v3140_v15  ;;  %v3138_v29 = vld [vmem:[#allocation6 + $0xa8] ss:$12 sps:$4 sm:$0xff]   ;;  %v3144_v31 = vld [vmem:[#allocation6 + $0x80] ss:$12 sps:$4 sm:$0xff]   ;;  %v3145_v33 = vld [vmem:[#allocation6 + $0x98] ss:$12 sps:$4 sm:$0xff]  }
  0xc5   : > { %2815 = vmatprep.subr.bf16.mxu1 %v3481_v1  ;;  %v3827_v30 = vld [vmem:[%s3798_s18] sm:$0xff]  ;;  %v669_v35 = vsub.s32 1, %v3815_v11  ;;  %s4163_s3 = sld [smem:[#allocation20_spill]]  ;;  %v665_v37 = vsub.s32 0, %v3815_v11  ;;  %vm889_vm3 = vcmask 523264   ;;  %s3484_s7 = smov 64  }
  0xc6   : > { %811 = vmatpush1.bf16.msra.mxu0 %v3123_v8  ;;  %v628_v32 = vpack.c.bf16 %v3827_v30, %v3827_v30  ;;  %v3146_v34 = vld [vmem:[#allocation6 + $0xb0] ss:$12 sps:$4 sm:$0xff]   ;;  %v673_v49 = vsub.s32 2, %v3815_v11  ;;  %vm954_vm4 = vcmask 1043456   ;;  %s4164_s5 = sld [smem:[#allocation22_spill]]  ;;  %s4166_s14 = sld [smem:[#allocation25_spill]] }
  0xc7   : > { %812 = vmatprep.subr.bf16.mxu0 %v3124_v10  ;;  %s608_s12 = scalar_lea.vmem %s4162_s1, %s607_s2  ;;  %s4167_s25 = sld [smem:[#allocation26_spill]] }
  0xc8   : > { %v2590_v24 = vld [vmem:[%s608_s12] ss:$0 sm:$0xff]  ;;  %2816 = vmatpush3.bf16.msra.mxu1 %v3141_v21  ;;  %s4165_s12 = sld [smem:[#allocation24_spill]]  ;;  %s4168_s28 = sld [smem:[#allocation27_spill]] }
  0xc9   : > { %v623_v25 = vadd.f32 %v2590_v24, %v615_v17  ;;  %2817 = vmatprep.subr.bf16.mxu1 %v3481_v1  ;;  %s4169_s19 = sld [smem:[#allocation28_spill]]  ;;  %s4170_s15 = sld [smem:[#allocation29_spill]] }
  0xca   : > { %813 = vmatpush1.bf16.msra.mxu0 %v3126_v12  ;;  %s2720_s18 = sshll.u32 %s3592_s27, 7  ;;  %s605_s2 = scalar_lea.vmem [#allocation12], %s2584_s26 }
  0xcb   : > { %814 = vmatprep.subr.bf16.mxu0 %v3127_v14  ;;  %625 = vst.msk [vmem:[#allocation2] sm:$0xff] %vm624_vm1, %v623_v25  ;;  %v661_v36 = vld [vmem:[%s4163_s3] sm:$0x7]  ;;  %s2457_s0 = sshll.u32 %s605_s2, 4  ;;  %s2444_s9 = scalar_lea.sflag [#allocation5], %s3792_s4  ;;  %s4061_s0 = int_to_ptr.vmem [resolvable:$true] %s2457_s0 }
  0xcc   : > { %2818 = vmatpush3.bf16.msra.mxu1 %v3142_v23  ;;  %v670_v38 = vrot.slane %v661_v36, %v669_v35  ;;  %v666_v39 = vrot.slane %v661_v36, %v665_v37  ;;  %v674_v50 = vrot.slane %v661_v36, %v673_v49  ;;  %s3395_s13 = scalar_lea.vmem %s4061_s0, 128  ;;  %p4172_p2 = scmp.ne.s32.totalorder %s4153_s16, 0 }
  0xcd   : > { %2819 = vmatprep.subr.bf16.mxu1 %v3481_v1  ;;  %p3396_p0 = scmp.ne.s32.totalorder %s4061_s0, %s3395_s13  ;;  %s3485_s27 = smov [#allocation12]  }
  0xce   : > { %815 = vmatpush1.bf16.msra.mxu0 %v3129_v18  ;;  %s3399_s26 = sshll.u32 %s3485_s27, 4  ;;  %s3400_s26 = int_to_ptr.vmem [resolvable:$false] %s3399_s26 }
  0xcf   : > { %816 = vmatprep.subr.bf16.mxu0 %v3130_v19  ;;  %p3397_p5 = pnand %p3396_p0, %p4172_p2  ;;  %p3402_p1 = scmp.lt.s32.totalorder %s4061_s0, %s3400_s26 }
  0xd0   : > { %2820 = vmatpush3.bf16.msra.mxu1 %v3143_v28 }
  0xd1   : > { %2821 = vmatprep.subr.bf16.mxu1 %v3481_v1  ;;  %p3398_p10 = pneg %p3397_p5 }
  0xd2   : > { %817 = vmatpush1.bf16.msra.mxu0 %v3132_v20  ;;  %v3864_v59 = vld [vmem:[#allocation2] sm:$0xff] }
  0xd3   : > { %818 = vmatprep.subr.bf16.mxu0 %v3133_v22 }
  0xd4   : > { %2822 = vmatpush3.bf16.msra.mxu1 %v3144_v31 }
  0xd5   : > { %2823 = vmatprep.subr.bf16.mxu1 %v3481_v1 }
  0xd6   : > { %819 = vmatpush1.bf16.msra.mxu0 %v3135_v26 }
  0xd7   : > { %820 = vmatprep.subr.bf16.mxu0 %v3136_v27 }
  0xd8   : > { %2824 = vmatpush3.bf16.msra.mxu1 %v3145_v33 }
  0xd9   : > { %2825 = vmatprep.subr.bf16.mxu1 %v3481_v1 }
  0xda   : > { %821 = vmatpush1.bf16.msra.mxu0 %v3138_v29 }
  0xdb   : > { %2855 = vmatprep.subr.bf16.mxu0 %v3481_v1 }
  0xdc   : > { %2826 = vmatpush3.bf16.msra.mxu1 %v3146_v34 }
  0xdd   : > { %839 = vmatmul.mubr.bf16.vlgmr.msra.gmra.mrb[0].mxu0 %v628_v32  ;;  %2831 = vmatprep.subr.bf16.mxu1 %v3481_v1 }
  0xde   : > { %2871 = vmatprep.mubr.msk.bf16.mxu0 %vm3483_vm2, %v3481_v1 }
  0xdf   : > { %2828 = vmatmul.mubr.bf16.vlgmr.msra.gmra.mrb[0].mxu1 %v628_v32 }
  0xe0   : > { %2833 = vmatprep.mubr.msk.bf16.mxu1 %vm3483_vm2, %v3481_v1 }
 0x1b0   : > { %v840_v40 = vpop.f32.mrb[0].mxu0 }
 0x1b1   : > { %v842_v41 = vpop.f32.mrb[1].mxu0  ;;  %v841_v45 = vadd.f32 %v840_v40, %v666_v39 }
 0x1b2   : > { %v843_v42 = vadd.f32 %v842_v41, %v670_v38  ;;  %v844_v43 = vpop.f32.mrb[2].mxu0  ;;  %v881_v51 = vpop.f32.mrb[0].mxu1 }
 0x1b3   : > { %v845_v44 = vpop.f32.mrb[3].mxu0  ;;  %v887_v48 = vpack.c.bf16 %v841_v45, %v841_v45  ;;  %v882_v52 = vadd.f32 %v881_v51, %v674_v50  ;;  %v2829_v53 = vpop.f32.mrb[1].mxu1  ;;  %v3148_v43 = vld [vmem:[#allocation8 + $0x8] sm:$0xff]   ;;  %v3150_v45 = vld [vmem:[#allocation8 + $0x18] sm:$0xff]  }
 0x1b4   : > { %v888_v46 = vpack.c.bf16 %v843_v42, %v843_v42  ;;  %v884_v54 = vpop.f32.mrb[2].mxu1  ;;  %v3147_v42 = vld [vmem:[#allocation8] sm:$0xff]   ;;  %v3149_v44 = vld [vmem:[#allocation8 + $0x10] sm:$0xff]   ;;  %v3154_v50 = vld [vmem:[#allocation8 + $0x38] sm:$0xff]  }
 0x1b5   : > { %v950_v55 = vpack.c.bf16 %v882_v52, %v882_v52  ;;  %v2830_v56 = vpop.f32.mrb[3].mxu1  ;;  %2856 = vmatpush3.bf16.msra.mxu0 %v3147_v42 }
 0x1b6   : > { %v894_v47 = vsel %vm889_vm3, %v888_v46, 0  ;;  %1002 = vrot.lane.b32.xlu1 %v888_v46, %s3484_s7  ;;  %2857 = vmatprep.subr.bf16.mxu0 %v3481_v1  ;;  %v3151_v46 = vld [vmem:[#allocation8 + $0x20] sm:$0xff]  }
 0x1b7   : > { %2832 = vmatpush3.bf16.xpose.msra.mxu1 %v894_v47  ;;  %v956_v57 = vsel %vm954_vm4, %v950_v55, 0  ;;  %v3152_v47 = vld [vmem:[#allocation8 + $0x28] sm:$0xff]  }
 0x1b8   : > { %2837 = vmatprep.subr.bf16.mxu1 %v3481_v1 }
 0x1b9   : > { %2858 = vmatpush3.bf16.msra.mxu0 %v3148_v43 }
 0x1ba   : > { %999 = vrot.lane.b32.xlu1 %v887_v48, %s3484_s7  ;;  %2859 = vmatprep.subr.bf16.mxu0 %v3481_v1 }
 0x1bd   : > { %2860 = vmatpush3.bf16.msra.mxu0 %v3149_v44 }
 0x1be   : > { %2834 = vmatmul.mubr.msk.bf16.vlgmr.msra.gmra.mrb[4].mxu1 %vm889_vm3, %v887_v48  ;;  %2861 = vmatprep.subr.bf16.mxu0 %v3481_v1  ;;  %v3153_v48 = vld [vmem:[#allocation8 + $0x30] sm:$0xff]  }
 0x1bf   : > { %2839 = vmatprep.mubr.msk.bf16.mxu1 %vm3483_vm2, %v3481_v1  ;;  %2838 = vmatpush3.bf16.msra.mxu1 %v956_v57 }
 0x1c0   : > { %2843 = vmatprep.subr.bf16.mxu1 %v3481_v1 }
 0x1c1   : > { %2862 = vmatpush3.bf16.msra.mxu0 %v3150_v45 }
 0x1c2   : > { %2863 = vmatprep.subr.bf16.mxu0 %v3481_v1 }
 0x1c5   : > { %2864 = vmatpush3.bf16.msra.mxu0 %v3151_v46 }
 0x1c6   : > { %2865 = vmatprep.subr.bf16.mxu0 %v3481_v1 }
 0x1c9   : > { %2866 = vmatpush3.bf16.msra.mxu0 %v3152_v47  ;;  %v3173_v47 = vld [vmem:[#allocation6 + $0xc4] ss:$12 sps:$4 sm:$0xff]  }
 0x1ca   : > { %2867 = vmatprep.subr.bf16.mxu0 %v3481_v1 }
 0x1cd   : > { %2868 = vmatpush3.bf16.msra.mxu0 %v3153_v48  ;;  %v3174_v48 = vld [vmem:[#allocation6 + $0xc8] ss:$12 sps:$4 sm:$0xff]  }
 0x1ce   : > { %2869 = vmatprep.subr.bf16.mxu0 %v3481_v1 }
 0x1d1   : > { %2870 = vmatpush3.bf16.msra.mxu0 %v3154_v50  ;;  %v2639_v50 = vld [vmem:[%s4166_s14] ss:$0 sm:$0xff] }
 0x1d2   : > { %2895 = vmatprep.subr.bf16.mxu0 %v3481_v1 }
 0x228   : > { %v1003_v13 = vpop.permute.xlu1 %1002 }
 0x229   : > { %v1008_v15 = vsel %vm889_vm3, %v1003_v13, 0  ;;  %v3163_v13 = vld [vmem:[#allocation11] sm:$0xff]  }
 0x22c   : > { %v1000_v16 = vpop.permute.xlu1 %999 }
 0x291   : > { %v930_v58 = vpop.f32.mrb[4].mxu1 }
 0x292   : > { %v936_v60 = vmul.f32 0.25, %v930_v58  ;;  %v2835_v61 = vpop.f32.mrb[5].mxu1  ;;  %v3155_v58 = vld [vmem:[#allocation9] sm:$0xff]  }
 0x293   : > { %v933_v62 = vpop.f32.mrb[6].mxu1 }
 0x294   : > { %v2836_v63 = vpop.f32.mrb[7].mxu1  ;;  %v937_v2 = vadd.f32 %v936_v60, %v3864_v59  ;;  %v2619_v60 = vld [vmem:[%s4164_s5] ss:$0 sm:$0xff] }
 0x296   : > { %v938_v3 = vsel %vm624_vm1, %v937_v2, -inf }
 0x297   : > { %939 = vmax.xlane.f32.xlu0 %v938_v3 }
 0x324   : > { %v940_v4 = vpop.xlane.xlu0 %939 }
 0x325   : > { %v941_v5 = vsub.f32 %v937_v2, %v940_v4 }
 0x327   : > { %v942_v6 = vmul.f32 1.442695, %v941_v5 }
 0x329   : > { %3227 = vpow2.f32 %v942_v6  ;;  %v3156_v6 = vld [vmem:[#allocation9 + $0x8] sm:$0xff]  }
 0x333   : > { %v3228_v7 = vpop.eup %3227 }
 0x334   : > { %v944_v8 = vsel %vm624_vm1, %v3228_v7, 0.0 }
 0x335   : > { %945 = vadd.xlane.f32.xlu0 %v944_v8  ;;  %v3158_v8 = vld [vmem:[#allocation9 + $0x18] sm:$0xff]  }
 0x3c2   : > { %v946_v9 = vpop.xlane.xlu0 %945 }
 0x3c3   : > { %3229 = vrcp.f32 %v946_v9  ;;  %v3159_v9 = vld [vmem:[#allocation9 + $0x20] sm:$0xff]  }
 0x3cd   : > { %v3230_v10 = vpop.eup %3229 }
 0x3ce   : > { %v948_v12 = vmul.f32 %v3230_v10, %v3228_v7  ;;  %v3157_v7 = vld [vmem:[#allocation9 + $0x10] sm:$0xff]   ;;  %v3160_v10 = vld [vmem:[#allocation9 + $0x28] sm:$0xff]  }
 0x3d0   : > { %v949_v14 = vpack.c.bf16 %v948_v12, %v948_v12  ;;  %v3162_v12 = vld [vmem:[#allocation9 + $0x38] sm:$0xff]  }
 0x3d2   : > { %2840 = vmatmul.mubr.msk.bf16.vlgmr.msra.gmra.mrb[8].mxu1 %vm624_vm1, %v949_v14  ;;  %v3164_v14 = vld [vmem:[#allocation11 + $0x8] sm:$0xff]  }
 0x3d3   : > { %2844 = vmatpush3.bf16.xpose.msra.mxu1 %v1008_v15  ;;  %2845 = vmatprep.mubr.msk.bf16.mxu1 %vm3483_vm2, %v3481_v1  ;;  %v3165_v15 = vld [vmem:[#allocation11 + $0x10] sm:$0xff]  }
 0x3d4   : > { %2849 = vmatprep.subr.bf16.mxu1 %v3481_v1 }
 0x3da   : > { %2846 = vmatmul.mubr.msk.bf16.vlgmr.msra.gmra.mrb[12].mxu1 %vm889_vm3, %v1000_v16  ;;  %v3166_v16 = vld [vmem:[#allocation11 + $0x18] sm:$0xff]  }
 0x3db   : > { %2851 = vmatprep.mubr.msk.bf16.mxu1 %vm3483_vm2, %v3481_v1 }
 0x4a5   : > { %v992_v17 = vpop.f32.mrb[8].mxu1 }
 0x4a6   : > { %v2841_v18 = vpop.f32.mrb[9].mxu1 }
 0x4a7   : > { %v995_v19 = vpop.f32.mrb[10].mxu1  ;;  %v3168_v18 = vld [vmem:[#allocation11 + $0x28] sm:$0xff]  }
 0x4a8   : > { %v2842_v20 = vpop.f32.mrb[11].mxu1 }
 0x4ad   : > { %v1044_v21 = vpop.f32.mrb[12].mxu1 }
 0x4ae   : > { %v1050_v22 = vmul.f32 0.25, %v1044_v21  ;;  %v2847_v23 = vpop.f32.mrb[13].mxu1 }
 0x4af   : > { %v1047_v24 = vpop.f32.mrb[14].mxu1 }
 0x4b0   : > { %v2848_v25 = vpop.f32.mrb[15].mxu1  ;;  %v1051_v26 = vadd.f32 %v1050_v22, %v3864_v59 }
 0x4b2   : > { %v1052_v27 = vsel %vm624_vm1, %v1051_v26, -inf }
 0x4b3   : > { %1053 = vmax.xlane.f32.xlu0 %v1052_v27 }
 0x4c9   : > { %1065 = vrot.lane.b32.xlu0 %v950_v55, %s3484_s7 }
 0x540   : > { %v1054_v28 = vpop.xlane.xlu0 %1053 }
 0x541   : > { %v1055_v29 = vsub.f32 %v1051_v26, %v1054_v28  ;;  %v2628_v28 = vld [vmem:[%s4113_s10] ss:$0 sm:$0xff] }
 0x543   : > { %v1056_v31 = vmul.f32 1.442695, %v1055_v29 }
 0x544   : > { %v1066_v32 = vpop.permute.xlu0 %1065 }
 0x545   : > { %3231 = vpow2.f32 %v1056_v31  ;;  %v1071_v33 = vsel %vm954_vm4, %v1066_v32, 0  ;;  %v2629_v31 = vld [vmem:[%s4114_s11] ss:$0 sm:$0xff] }
 0x546   : > { %2850 = vmatpush3.bf16.msra.mxu1 %v1071_v33 }
 0x547   : > { %2875 = vmatprep.subr.bf16.mxu1 %v3481_v1 }
 0x54f   : > { %v3232_v34 = vpop.eup %3231 }
 0x550   : > { %v1058_v36 = vsel %vm624_vm1, %v3232_v34, 0.0 }
 0x551   : > { %1059 = vadd.xlane.f32.xlu1 %v1058_v36  ;;  %v3169_v36 = vld [vmem:[#allocation11 + $0x30] sm:$0xff]  }
 0x5de   : > { %v1060_v38 = vpop.xlane.xlu1 %1059 }
 0x5df   : > { %3233 = vrcp.f32 %v1060_v38  ;;  %v3170_v38 = vld [vmem:[#allocation11 + $0x38] sm:$0xff]  }
 0x5e9   : > { %v3234_v39 = vpop.eup %3233 }
 0x5ea   : > { %v1062_v40 = vmul.f32 %v3234_v39, %v3232_v34  ;;  %v2630_v39 = vld [vmem:[%s4165_s12] ss:$0 sm:$0xff] }
 0x5ec   : > { %v1063_v41 = vpack.c.bf16 %v1062_v40, %v1062_v40 }
 0x5ee   : > { %2852 = vmatmul.mubr.msk.bf16.vlgmr.msra.gmra.mrb[16].mxu1 %vm624_vm1, %v1063_v41 }
 0x5ef   : > { %2891 = vmatprep.mubr.msk.bf16.mxu1 %vm3483_vm2, %v3481_v1  ;;  %2876 = vmatpush3.bf16.msra.mxu1 %v3155_v58  ;;  %v3177_v58 = vld [vmem:[#allocation6 + $0xdc] ss:$12 sps:$4 sm:$0xff]  }
 0x5f0   : > { %2877 = vmatprep.subr.bf16.mxu1 %v3481_v1 }
 0x5f3   : > { %2878 = vmatpush3.bf16.msra.mxu1 %v3156_v6  ;;  %v3189_v6 = vld [vmem:[#allocation6 + $0x124] ss:$12 sps:$4 sm:$0xff]  }
 0x5f4   : > { %2879 = vmatprep.subr.bf16.mxu1 %v3481_v1 }
 0x5f7   : > { %2880 = vmatpush3.bf16.msra.mxu1 %v3157_v7  ;;  %v3187_v7 = vld [vmem:[#allocation6 + $0x120] ss:$12 sps:$4 sm:$0xff]  }
 0x5f8   : > { %2881 = vmatprep.subr.bf16.mxu1 %v3481_v1 }
 0x5fb   : > { %2882 = vmatpush3.bf16.msra.mxu1 %v3158_v8  ;;  %v3190_v8 = vld [vmem:[#allocation6 + $0x128] ss:$12 sps:$4 sm:$0xff]  }
 0x5fc   : > { %2883 = vmatprep.subr.bf16.mxu1 %v3481_v1 }
 0x5ff   : > { %2884 = vmatpush3.bf16.msra.mxu1 %v3159_v9  ;;  %v3193_v9 = vld [vmem:[#allocation6 + $0x13c] ss:$12 sps:$4 sm:$0xff]  }
 0x600   : > { %2885 = vmatprep.subr.bf16.mxu1 %v3481_v1 }
 0x603   : > { %2886 = vmatpush3.bf16.msra.mxu1 %v3160_v10  ;;  %v3191_v10 = vld [vmem:[#allocation6 + $0x138] ss:$12 sps:$4 sm:$0xff]  }
 0x604   : > { %2887 = vmatprep.subr.bf16.mxu1 %v3481_v1 }
 0x6c1   : > { %v1107_v51 = vpop.f32.mrb[16].mxu1 }
 0x6c2   : > { %1114 = vrot.lane.b32.xlu0 %v1107_v51, %s3484_s7  ;;  %v2853_v52 = vpop.f32.mrb[17].mxu1 }
 0x6c3   : > { %v1110_v53 = vpop.f32.mrb[18].mxu1 }
 0x6c4   : > { %v2854_v54 = vpop.f32.mrb[19].mxu1 }
 0x734   : > { %v1115_v55 = vpop.permute.xlu0 %1114 }
 0x735   : > { %v1117_v56 = vsel %vm889_vm3, %v992_v17, %v1115_v55  ;;  %v3167_v17 = vld [vmem:[#allocation11 + $0x20] sm:$0xff]  }
 0x736   : > { %v1118_v57 = vpack.c.bf16 %v1117_v56, %v1117_v56 }
 0x738   : > { %2872 = vmatmul.mubr.bf16.vlgmr.msra.gmra.mrb[4].mxu0 %v1118_v57 }
 0x739   : > { %2911 = vmatprep.mubr.msk.bf16.mxu0 %vm3483_vm2, %v3481_v1  ;;  %2896 = vmatpush3.bf16.msra.mxu0 %v3163_v13  ;;  %v3195_v13 = vld [vmem:[#allocation6 + $0x150] ss:$12 sps:$4 sm:$0xff]  }
 0x73a   : > { %2897 = vmatprep.subr.bf16.mxu0 %v3481_v1 }
 0x73d   : > { %2898 = vmatpush3.bf16.msra.mxu0 %v3164_v14  ;;  %v3198_v14 = vld [vmem:[#allocation6 + $0x158] ss:$12 sps:$4 sm:$0xff]  }
 0x73e   : > { %2899 = vmatprep.subr.bf16.mxu0 %v3481_v1 }
 0x741   : > { %2900 = vmatpush3.bf16.msra.mxu0 %v3165_v15  ;;  %v3201_v15 = vld [vmem:[#allocation6 + $0x16c] ss:$12 sps:$4 sm:$0xff]  }
 0x742   : > { %2901 = vmatprep.subr.bf16.mxu0 %v3481_v1 }
 0x745   : > { %2902 = vmatpush3.bf16.msra.mxu0 %v3166_v16  ;;  %v3199_v16 = vld [vmem:[#allocation6 + $0x168] ss:$12 sps:$4 sm:$0xff]  }
 0x746   : > { %2903 = vmatprep.subr.bf16.mxu0 %v3481_v1 }
 0x749   : > { %2904 = vmatpush3.bf16.msra.mxu0 %v3167_v17  ;;  %v3202_v17 = vld [vmem:[#allocation6 + $0x170] ss:$12 sps:$4 sm:$0xff]  }
 0x74a   : > { %2905 = vmatprep.subr.bf16.mxu0 %v3481_v1 }
 0x74d   : > { %2906 = vmatpush3.bf16.msra.mxu0 %v3168_v18 }
 0x74e   : > { %2907 = vmatprep.subr.bf16.mxu0 %v3481_v1 }
 0x751   : > { %2908 = vmatpush3.bf16.msra.mxu0 %v3169_v36 }
 0x752   : > { %2909 = vmatprep.subr.bf16.mxu0 %v3481_v1 }
 0x755   : > { %2910 = vmatpush3.bf16.msra.mxu0 %v3170_v38 }
 0x756   : > { %2915 = vmatprep.subr.bf16.mxu0 %v3481_v1 }
 0x80b   : > { %v1224_v61 = vpop.f32.mrb[4].mxu0 }
 0x80c   : > { %v1225_v62 = vadd.f32 %v2619_v60, %v1224_v61  ;;  %v2873_v63 = vpop.f32.mrb[5].mxu0  ;;  %v3175_v60 = vld [vmem:[#allocation6 + $0xd8] ss:$12 sps:$4 sm:$0xff]   ;;  %v3178_v61 = vld [vmem:[#allocation6 + $0xe0] ss:$12 sps:$4 sm:$0xff]  }
 0x80d   : > { %v1227_v2 = vpop.f32.mrb[6].mxu0  ;;  %v3179_v63 = vld [vmem:[#allocation6 + $0xf0] ss:$12 sps:$4 sm:$0xff]  }
 0x80e   : > { %v1230_v3 = vadd.f32 %v1225_v62, %v3827_v30  ;;  %v2874_v4 = vpop.f32.mrb[7].mxu0  ;;  %v3161_v30 = vld [vmem:[#allocation9 + $0x30] sm:$0xff]   ;;  %v3182_v2 = vld [vmem:[#allocation6 + $0xf8] ss:$12 sps:$4 sm:$0xff]  }
 0x80f   : > { %2888 = vmatpush3.bf16.msra.mxu1 %v3161_v30  ;;  %v3181_v62 = vld [vmem:[#allocation6 + $0xf4] ss:$12 sps:$4 sm:$0xff]  }
 0x810   : > { %1233 = vadd.xlane.f32.xlu0 %v1230_v3  ;;  %v1236_v5 = vmul.f32 %v1230_v3, %v1230_v3  ;;  %2889 = vmatprep.subr.bf16.mxu1 %v3481_v1  ;;  %v3183_v4 = vld [vmem:[#allocation6 + $0x108] ss:$12 sps:$4 sm:$0xff]   ;;  %v3194_v30 = vld [vmem:[#allocation6 + $0x140] ss:$12 sps:$4 sm:$0xff]  }
 0x812   : > { %1237 = vadd.xlane.f32.xlu1 %v1236_v5  ;;  %v3186_v5 = vld [vmem:[#allocation6 + $0x110] ss:$12 sps:$4 sm:$0xff]  }
 0x813   : > { %2890 = vmatpush3.bf16.msra.mxu1 %v3162_v12  ;;  %v3197_v12 = vld [vmem:[#allocation6 + $0x154] ss:$12 sps:$4 sm:$0xff]  }
 0x814   : > { %1696 = vmatprep.subr.bf16.mxu1 %v3173_v47 }
 0x89d   : > { %v1234_v19 = vpop.xlane.xlu0 %1233 }
 0x89e   : > { %v1235_v20 = vmul.f32 0.03125, %v1234_v19 }
 0x89f   : > { %v1238_v21 = vpop.xlane.xlu1 %1237 }
 0x8a0   : > { %v1240_v22 = vmul.f32 %v1235_v20, %v1235_v20  ;;  %v1239_v23 = vmul.f32 0.03125, %v1238_v21  ;;  %v1242_v26 = vsub.f32 %v1230_v3, %v1235_v20  ;;  %v3185_v3 = vld [vmem:[#allocation6 + $0x10c] ss:$12 sps:$4 sm:$0xff]  }
 0x8a2   : > { %v1241_v24 = vsub.f32 %v1239_v23, %v1240_v22 }
 0x8a4   : > { %v1243_v25 = vadd.f32 1e-05, %v1241_v24 }
 0x8a6   : > { %3235 = vrsqrt.f32 %v1243_v25 }
 0x8b0   : > { %v3236_v27 = vpop.eup %3235 }
 0x8b1   : > { %v1245_v29 = vmul.f32 %v3236_v27, %v1242_v26  ;;  %v2648_v27 = vld [vmem:[%s4167_s25] ss:$0 sm:$0xff] }
 0x8b3   : > { %v1252_v32 = vmul.f32 %v2628_v28, %v1245_v29  ;;  %v2649_v29 = vld [vmem:[%s4168_s28] ss:$0 sm:$0xff] }
 0x8b5   : > { %v1259_v33 = vadd.f32 %v2629_v31, %v1252_v32 }
 0x8b7   : > { %v1260_v34 = vpack.c.bf16 %v1259_v33, %v1259_v33 }
 0x8b9   : > { %2892 = vmatmul.mubr.bf16.vlgmr.msra.gmra.mrb[20].mxu1 %v1260_v34  ;;  %v2650_v34 = vld [vmem:[%s4163_s3 + $0x3] sm:$0x7] }
 0x8ba   : > { %1728 = vmatprep.mubr.bf16.mxu1 %v3480_v0  ;;  %v3171_v0 = vld [vmem:[#allocation6 + $0xc0] ss:$12 sps:$4 sm:$0xff]   ;;  %v1556_v36 = vrot.slane %v2650_v34, %v665_v37  ;;  %v1560_v38 = vrot.slane %v2650_v34, %v669_v35 }
 0x8bb   : > { %1697 = vmatpush1.bf16.msra.mxu1 %v3171_v0 }
 0x8bc   : > { %1698 = vmatprep.subr.bf16.mxu1 %v3177_v58 }
 0x8bf   : > { %1699 = vmatpush1.bf16.msra.mxu1 %v3175_v60 }
 0x8c0   : > { %1700 = vmatprep.subr.bf16.mxu1 %v3181_v62 }
 0x8c3   : > { %1701 = vmatpush1.bf16.msra.mxu1 %v3179_v63 }
 0x8c4   : > { %1702 = vmatprep.subr.bf16.mxu1 %v3185_v3 }
 0x8c7   : > { %1703 = vmatpush1.bf16.msra.mxu1 %v3183_v4 }
 0x8c8   : > { %1704 = vmatprep.subr.bf16.mxu1 %v3189_v6 }
 0x8cb   : > { %1705 = vmatpush1.bf16.msra.mxu1 %v3187_v7 }
 0x8cc   : > { %1706 = vmatprep.subr.bf16.mxu1 %v3193_v9 }
 0x8cf   : > { %1707 = vmatpush1.bf16.msra.mxu1 %v3191_v10 }
 0x8d0   : > { %1708 = vmatprep.subr.bf16.mxu1 %v3197_v12 }
 0x8d3   : > { %1709 = vmatpush1.bf16.msra.mxu1 %v3195_v13 }
 0x8d4   : > { %1710 = vmatprep.subr.bf16.mxu1 %v3201_v15 }
 0x8d7   : > { %1711 = vmatpush1.bf16.msra.mxu1 %v3199_v16 }
 0x8d8   : > { %2935 = vmatprep.subr.bf16.mxu1 %v3481_v1 }
 0x98c   : > { %v1366_v40 = vpop.f32.mrb[20].mxu1 }
 0x98d   : > { %v1367_v41 = vadd.f32 %v2630_v39, %v1366_v40  ;;  %v2893_v42 = vpop.f32.mrb[21].mxu1 }
 0x98e   : > { %v1369_v43 = vpop.f32.mrb[22].mxu1 }
 0x98f   : > { %v1372_v44 = vmax.f32 %v1367_v41, 0.0  ;;  %v2894_v45 = vpop.f32.mrb[23].mxu1 }
 0x991   : > { %v1373_v46 = vpack.c.bf16 %v1372_v44, %v1372_v44  ;;  %v1564_v44 = vrot.slane %v2650_v34, %v673_v49  ;;  %v3204_v34 = vld [vmem:[#allocation8 + $0x48] sm:$0xff]  }
 0x993   : > { %2912 = vmatmul.mubr.bf16.vlgmr.msra.gmra.mrb[8].mxu0 %v1373_v46 }
 0x994   : > { %2931 = vmatprep.mubr.msk.bf16.mxu0 %vm3483_vm2, %v3481_v1  ;;  %2916 = vmatpush3.bf16.msra.mxu0 %v3174_v48 }
 0x995   : > { %2917 = vmatprep.subr.bf16.mxu0 %v3481_v1 }
 0x998   : > { %2918 = vmatpush3.bf16.msra.mxu0 %v3178_v61 }
 0x999   : > { %2919 = vmatprep.subr.bf16.mxu0 %v3481_v1 }
 0x99c   : > { %2920 = vmatpush3.bf16.msra.mxu0 %v3182_v2 }
 0x99d   : > { %2921 = vmatprep.subr.bf16.mxu0 %v3481_v1 }
 0x9a0   : > { %2922 = vmatpush3.bf16.msra.mxu0 %v3186_v5 }
 0x9a1   : > { %2923 = vmatprep.subr.bf16.mxu0 %v3481_v1 }
 0x9a4   : > { %2924 = vmatpush3.bf16.msra.mxu0 %v3190_v8 }
 0x9a5   : > { %2925 = vmatprep.subr.bf16.mxu0 %v3481_v1 }
 0x9a8   : > { %2926 = vmatpush3.bf16.msra.mxu0 %v3194_v30 }
 0x9a9   : > { %2927 = vmatprep.subr.bf16.mxu0 %v3481_v1 }
 0x9ac   : > { %2928 = vmatpush3.bf16.msra.mxu0 %v3198_v14 }
 0x9ad   : > { %2929 = vmatprep.subr.bf16.mxu0 %v3481_v1 }
 0x9b0   : > { %2930 = vmatpush3.bf16.msra.mxu0 %v3202_v17 }
 0x9b1   : > { %2959 = vmatprep.subr.bf16.mxu0 %v3481_v1 }
 0xa66   : > { %v1479_v51 = vpop.f32.mrb[8].mxu0 }
 0xa67   : > { %v1480_v52 = vadd.f32 %v2639_v50, %v1479_v51  ;;  %v2913_v53 = vpop.f32.mrb[9].mxu0 }
 0xa68   : > { %v1482_v54 = vpop.f32.mrb[10].mxu0 }
 0xa69   : > { %v3933_v55 = vadd.f32 %v1480_v52, %v1259_v33  ;;  %v2914_v56 = vpop.f32.mrb[11].mxu0 }
 0xa6b   : > { %1488 = vadd.xlane.f32.xlu1 %v3933_v55  ;;  %v1491_v57 = vmul.f32 %v3933_v55, %v3933_v55 }
 0xa6f   : > { %1492 = vadd.xlane.f32.xlu1 %v1491_v57 }
 0xaf8   : > { %v1489_v18 = vpop.xlane.xlu1 %1488 }
 0xaf9   : > { %v1490_v19 = vmul.f32 0.03125, %v1489_v18 }
 0xafb   : > { %v1495_v21 = vmul.f32 %v1490_v19, %v1490_v19  ;;  %v1497_v25 = vsub.f32 %v3933_v55, %v1490_v19 }
 0xafc   : > { %v1493_v20 = vpop.xlane.xlu1 %1492 }
 0xafd   : > { %v1494_v22 = vmul.f32 0.03125, %v1493_v20 }
 0xaff   : > { %v1496_v23 = vsub.f32 %v1494_v22, %v1495_v21 }
 0xb01   : > { %v1498_v24 = vadd.f32 1e-05, %v1496_v23 }
 0xb03   : > { %3237 = vrsqrt.f32 %v1498_v24 }
 0xb0d   : > { %v3238_v26 = vpop.eup %3237 }
 0xb0e   : > { %v1500_v28 = vmul.f32 %v3238_v26, %v1497_v25 }
 0xb10   : > { %v1507_v31 = vmul.f32 %v2648_v27, %v1500_v28 }
 0xb12   : > { %v3953_v32 = vadd.f32 %v2649_v29, %v1507_v31 }
 0xb14   : > { %v1516_v33 = vpack.c.bf16 %v3953_v32, %v3953_v32 }
 0xb16   : > { %1729 = vmatmul.mubr.bf16.vlgmr.msra.gmra.mrb[24].mxu1 %v1516_v33  ;;  %2932 = vmatmul.mubr.bf16.vlgmr.msra.gmra.mrb[12].mxu0 %v1516_v33  ;;  %v3203_v33 = vld [vmem:[#allocation8 + $0x40] sm:$0xff]  }
 0xb17   : > { %2937 = vmatprep.mubr.msk.bf16.mxu1 %vm3483_vm2, %v3481_v1  ;;  %2975 = vmatprep.mubr.msk.bf16.mxu0 %vm3483_vm2, %v3481_v1 }
 0xb18   : > { %2960 = vmatpush3.bf16.msra.mxu0 %v3203_v33 }
 0xb19   : > { %2961 = vmatprep.subr.bf16.mxu0 %v3481_v1 }
 0xb1c   : > { %2962 = vmatpush3.bf16.msra.mxu0 %v3204_v34 }
 0xb1d   : > { %2963 = vmatprep.subr.bf16.mxu0 %v3481_v1 }
 0xbe9   : > { %v1730_v39 = vpop.f32.mrb[24].mxu1  ;;  %v1771_v40 = vpop.f32.mrb[12].mxu0 }
 0xbea   : > { %v1731_v41 = vadd.f32 %v1730_v39, %v1556_v36  ;;  %v1732_v42 = vpop.f32.mrb[25].mxu1  ;;  %v2933_v43 = vpop.f32.mrb[13].mxu0  ;;  %v1772_v37 = vadd.f32 %v1771_v40, %v1564_v44  ;;  %v3205_v36 = vld [vmem:[#allocation8 + $0x50] sm:$0xff]   ;;  %v3207_v39 = vld [vmem:[#allocation8 + $0x60] sm:$0xff]   ;;  %v3208_v40 = vld [vmem:[#allocation8 + $0x68] sm:$0xff]  }
 0xbeb   : > { %v1733_v45 = vadd.f32 %v1732_v42, %v1560_v38  ;;  %v1734_v46 = vpop.f32.mrb[26].mxu1  ;;  %v1774_v0 = vpop.f32.mrb[14].mxu0  ;;  %2964 = vmatpush3.bf16.msra.mxu0 %v3205_v36  ;;  %v3206_v38 = vld [vmem:[#allocation8 + $0x58] sm:$0xff]  }
 0xbec   : > { %v1777_v47 = vpack.c.bf16 %v1731_v41, %v1731_v41  ;;  %v1735_v48 = vpop.f32.mrb[27].mxu1  ;;  %v2934_v50 = vpop.f32.mrb[15].mxu0  ;;  %v1839_v52 = vpack.c.bf16 %v1772_v37, %v1772_v37  ;;  %2965 = vmatprep.subr.bf16.mxu0 %v3481_v1  ;;  %v3209_v41 = vld [vmem:[#allocation8 + $0x70] sm:$0xff]   ;;  %v3210_v42 = vld [vmem:[#allocation8 + $0x78] sm:$0xff]  }
 0xbed   : > { %v1778_v51 = vpack.c.bf16 %v1733_v45, %v1733_v45  ;;  %v3211_v50 = vld [vmem:[#allocation9 + $0x40] sm:$0xff]  }
 0xbee   : > { %1887 = vrot.lane.b32.xlu0 %v1777_v47, %s3484_s7  ;;  %v1844_v53 = vsel %vm954_vm4, %v1839_v52, 0 }
 0xbef   : > { %v1783_v35 = vsel %vm889_vm3, %v1778_v51, 0  ;;  %2966 = vmatpush3.bf16.msra.mxu0 %v3206_v38 }
 0xbf0   : > { %2936 = vmatpush3.bf16.xpose.msra.mxu1 %v1783_v35  ;;  %2967 = vmatprep.subr.bf16.mxu0 %v3481_v1 }
 0xbf1   : > { %2941 = vmatprep.subr.bf16.mxu1 %v3481_v1 }
 0xbf3   : > { %2968 = vmatpush3.bf16.msra.mxu0 %v3207_v39 }
 0xbf4   : > { %2969 = vmatprep.subr.bf16.mxu0 %v3481_v1 }
 0xbf7   : > { %2938 = vmatmul.mubr.msk.bf16.vlgmr.msra.gmra.mrb[28].mxu1 %vm889_vm3, %v1777_v47  ;;  %2970 = vmatpush3.bf16.msra.mxu0 %v3208_v40 }
 0xbf8   : > { %2942 = vmatpush3.bf16.msra.mxu1 %v1844_v53  ;;  %2943 = vmatprep.mubr.msk.bf16.mxu1 %vm3483_vm2, %v3481_v1 }
 0xbf9   : > { %2947 = vmatprep.subr.bf16.mxu1 %v3481_v1  ;;  %2971 = vmatprep.subr.bf16.mxu0 %v3481_v1 }
 0xbfb   : > { %2972 = vmatpush3.bf16.msra.mxu0 %v3209_v41 }
 0xbfc   : > { %2973 = vmatprep.subr.bf16.mxu0 %v3481_v1 }
 0xbff   : > { %2974 = vmatpush3.bf16.msra.mxu0 %v3210_v42 }
 0xc00   : > { %2999 = vmatprep.subr.bf16.mxu0 %v3481_v1 }
 0xc60   : > { %v1888_v9 = vpop.permute.xlu0 %1887 }
 0xcca   : > { %v1819_v11 = vpop.f32.mrb[28].mxu1 }
 0xccb   : > { %v1825_v49 = vmul.f32 0.25, %v1819_v11  ;;  %v2939_v54 = vpop.f32.mrb[29].mxu1 }
 0xccc   : > { %v1822_v55 = vpop.f32.mrb[30].mxu1 }
 0xccd   : > { %v2940_v56 = vpop.f32.mrb[31].mxu1  ;;  %v1826_v57 = vadd.f32 %v1825_v49, %v3864_v59  ;;  %v3212_v55 = vld [vmem:[#allocation9 + $0x48] sm:$0xff]  }
 0xcce   : > { %v3213_v56 = vld [vmem:[#allocation9 + $0x50] sm:$0xff]  }
 0xccf   : > { %v1827_v58 = vsel %vm624_vm1, %v1826_v57, -inf }
 0xcd0   : > { %1828 = vmax.xlane.f32.xlu1 %v1827_v58  ;;  %v3215_v58 = vld [vmem:[#allocation9 + $0x60] sm:$0xff]  }
 0xd5d   : > { %v1829_v60 = vpop.xlane.xlu1 %1828 }
 0xd5e   : > { %v1830_v61 = vsub.f32 %v1826_v57, %v1829_v60  ;;  %v3214_v57 = vld [vmem:[#allocation9 + $0x58] sm:$0xff]   ;;  %v3216_v60 = vld [vmem:[#allocation9 + $0x68] sm:$0xff]  }
 0xd60   : > { %v1831_v62 = vmul.f32 1.442695, %v1830_v61  ;;  %v3218_v61 = vld [vmem:[#allocation9 + $0x78] sm:$0xff]  }
 0xd62   : > { %3239 = vpow2.f32 %v1831_v62  ;;  %v3219_v62 = vld [vmem:[#allocation11 + $0x40] sm:$0xff]  }
 0xd6c   : > { %v3240_v63 = vpop.eup %3239 }
 0xd6d   : > { %v1833_v2 = vsel %vm624_vm1, %v3240_v63, 0.0 }
 0xd6e   : > { %1834 = vadd.xlane.f32.xlu1 %v1833_v2  ;;  %v3221_v2 = vld [vmem:[#allocation11 + $0x50] sm:$0xff]  }
 0xd7f   : > { %1890 = vrot.lane.b32.xlu1 %v1778_v51, %s3484_s7  ;;  %v2680_v51 = vld [vmem:[%s4164_s5 + $0x1] ss:$0 sm:$0xff]  ;;  %s4171_s5 = sld [smem:[#allocation30_spill]] }
 0xd85   : > { %s4059_s6 = scalar_lea.hbm %s4171_s5, %s2720_s18 }
 0xdfb   : > { %v1835_v3 = vpop.xlane.xlu1 %1834 }
 0xdfc   : > { %3241 = vrcp.f32 %v1835_v3  ;;  %v3222_v3 = vld [vmem:[#allocation11 + $0x58] sm:$0xff]  }
 0xdff   : > { %v1891_v6 = vpop.permute.xlu1 %1890 }
 0xe00   : > { %v1896_v8 = vsel %vm889_vm3, %v1891_v6, 0 }
 0xe06   : > { %v3242_v4 = vpop.eup %3241 }
 0xe07   : > { %v1837_v5 = vmul.f32 %v3242_v4, %v3240_v63  ;;  %v3220_v63 = vld [vmem:[#allocation11 + $0x48] sm:$0xff]   ;;  %v3223_v4 = vld [vmem:[#allocation11 + $0x60] sm:$0xff]  }
 0xe09   : > { %v1838_v7 = vpack.c.bf16 %v1837_v5, %v1837_v5  ;;  %v3224_v5 = vld [vmem:[#allocation11 + $0x68] sm:$0xff]  }
 0xe0b   : > { %2944 = vmatmul.mubr.msk.bf16.vlgmr.msra.gmra.mrb[32].mxu1 %vm624_vm1, %v1838_v7 }
 0xe0c   : > { %2948 = vmatpush3.bf16.xpose.msra.mxu1 %v1896_v8  ;;  %2949 = vmatprep.mubr.msk.bf16.mxu1 %vm3483_vm2, %v3481_v1 }
 0xe0d   : > { %2953 = vmatprep.subr.bf16.mxu1 %v3481_v1 }
 0xe13   : > { %2950 = vmatmul.mubr.msk.bf16.vlgmr.msra.gmra.mrb[36].mxu1 %vm889_vm3, %v1888_v9 }
 0xe14   : > { %2955 = vmatprep.mubr.msk.bf16.mxu1 %vm3483_vm2, %v3481_v1 }
 0xede   : > { %v1880_v10 = vpop.f32.mrb[32].mxu1 }
 0xedf   : > { %v2945_v30 = vpop.f32.mrb[33].mxu1 }
 0xee0   : > { %v1883_v12 = vpop.f32.mrb[34].mxu1 }
 0xee1   : > { %v2946_v13 = vpop.f32.mrb[35].mxu1 }
 0xee6   : > { %v1932_v14 = vpop.f32.mrb[36].mxu1 }
 0xee7   : > { %v1938_v15 = vmul.f32 0.25, %v1932_v14  ;;  %v2951_v16 = vpop.f32.mrb[37].mxu1 }
 0xee8   : > { %v1935_v17 = vpop.f32.mrb[38].mxu1 }
 0xee9   : > { %v2952_v18 = vpop.f32.mrb[39].mxu1  ;;  %v1939_v19 = vadd.f32 %v1938_v15, %v3864_v59  ;;  %v2691_v15 = vld [vmem:[%s4113_s10 + $0x1] ss:$0 sm:$0xff] }
 0xeea   : > { %v2692_v17 = vld [vmem:[%s4114_s11 + $0x1] ss:$0 sm:$0xff] }
 0xeeb   : > { %v1940_v20 = vsel %vm624_vm1, %v1939_v19, -inf }
 0xeec   : > { %1941 = vmax.xlane.f32.xlu1 %v1940_v20 }
 0xefd   : > { %1953 = vrot.lane.b32.xlu1 %v1839_v52, %s3484_s7 }
 0xf79   : > { %v1942_v21 = vpop.xlane.xlu1 %1941 }
 0xf7a   : > { %v1943_v22 = vsub.f32 %v1939_v19, %v1942_v21  ;;  %v3225_v21 = vld [vmem:[#allocation11 + $0x70] sm:$0xff]  }
 0xf7c   : > { %v1944_v23 = vmul.f32 1.442695, %v1943_v22  ;;  %v3226_v22 = vld [vmem:[#allocation11 + $0x78] sm:$0xff]  }
 0xf7d   : > { %v1954_v24 = vpop.permute.xlu1 %1953 }
 0xf7e   : > { %3243 = vpow2.f32 %v1944_v23  ;;  %v1959_v25 = vsel %vm954_vm4, %v1954_v24, 0  ;;  %v2694_v23 = vld [vmem:[%s4165_s12 + $0x1] ss:$0 sm:$0xff] }
 0xf7f   : > { %2954 = vmatpush3.bf16.msra.mxu1 %v1959_v25 }
 0xf80   : > { %2979 = vmatprep.subr.bf16.mxu1 %v3481_v1 }
 0xf88   : > { %v3244_v26 = vpop.eup %3243 }
 0xf89   : > { %v1946_v27 = vsel %vm624_vm1, %v3244_v26, 0.0 }
 0xf8a   : > { %1947 = vadd.xlane.f32.xlu0 %v1946_v27 }
0x1017   : > { %v1948_v59 = vpop.xlane.xlu0 %1947 }
0x1018   : > { %3245 = vrcp.f32 %v1948_v59 }
0x1022   : > { %v3246_v28 = vpop.eup %3245 }
0x1023   : > { %v1950_v29 = vmul.f32 %v3246_v28, %v3244_v26 }
0x1025   : > { %v1951_v31 = vpack.c.bf16 %v1950_v29, %v1950_v29 }
0x1027   : > { %2956 = vmatmul.mubr.msk.bf16.vlgmr.msra.gmra.mrb[40].mxu1 %vm624_vm1, %v1951_v31  ;;  %v2704_v31 = vld [vmem:[%s4166_s14 + $0x1] ss:$0 sm:$0xff] }
0x1028   : > { %2995 = vmatprep.mubr.msk.bf16.mxu1 %vm3483_vm2, %v3481_v1  ;;  %2980 = vmatpush3.bf16.msra.mxu1 %v3211_v50  ;;  %v2715_v50 = vld [vmem:[%s4167_s25 + $0x1] ss:$0 sm:$0xff] }
0x1029   : > { %2981 = vmatprep.subr.bf16.mxu1 %v3481_v1 }
0x102c   : > { %2982 = vmatpush3.bf16.msra.mxu1 %v3212_v55 }
0x102d   : > { %2983 = vmatprep.subr.bf16.mxu1 %v3481_v1 }
0x1030   : > { %2984 = vmatpush3.bf16.msra.mxu1 %v3213_v56 }
0x1031   : > { %2985 = vmatprep.subr.bf16.mxu1 %v3481_v1 }
0x1034   : > { %2986 = vmatpush3.bf16.msra.mxu1 %v3214_v57 }
0x1035   : > { %2987 = vmatprep.subr.bf16.mxu1 %v3481_v1 }
0x1038   : > { %2988 = vmatpush3.bf16.msra.mxu1 %v3215_v58 }
0x1039   : > { %2989 = vmatprep.subr.bf16.mxu1 %v3481_v1 }
0x103c   : > { %2990 = vmatpush3.bf16.msra.mxu1 %v3216_v60 }
0x103d   : > { %2991 = vmatprep.subr.bf16.mxu1 %v3481_v1 }
0x10fa   : > { %v1995_v43 = vpop.f32.mrb[40].mxu1 }
0x10fb   : > { %2002 = vrot.lane.b32.xlu0 %v1995_v43, %s3484_s7  ;;  %v2957_v44 = vpop.f32.mrb[41].mxu1 }
0x10fc   : > { %v1998_v45 = vpop.f32.mrb[42].mxu1 }
0x10fd   : > { %v2958_v46 = vpop.f32.mrb[43].mxu1 }
0x116d   : > { %v2003_v0 = vpop.permute.xlu0 %2002 }
0x116e   : > { %v2005_v47 = vsel %vm889_vm3, %v1880_v10, %v2003_v0 }
0x116f   : > { %v2006_v48 = vpack.c.bf16 %v2005_v47, %v2005_v47 }
0x1171   : > { %2976 = vmatmul.mubr.bf16.vlgmr.msra.gmra.mrb[16].mxu0 %v2006_v48 }
0x1172   : > { %3015 = vmatprep.mubr.msk.bf16.mxu0 %vm3483_vm2, %v3481_v1  ;;  %3000 = vmatpush3.bf16.msra.mxu0 %v3219_v62 }
0x1173   : > { %3001 = vmatprep.subr.bf16.mxu0 %v3481_v1 }
0x1176   : > { %3002 = vmatpush3.bf16.msra.mxu0 %v3220_v63  ;;  %v2718_v63 = vld [vmem:[%s4170_s15] ss:$0 sm:$0xff] }
0x1177   : > { %3003 = vmatprep.subr.bf16.mxu0 %v3481_v1 }
0x117a   : > { %3004 = vmatpush3.bf16.msra.mxu0 %v3221_v2 }
0x117b   : > { %3005 = vmatprep.subr.bf16.mxu0 %v3481_v1 }
0x117e   : > { %3006 = vmatpush3.bf16.msra.mxu0 %v3222_v3 }
0x117f   : > { %3007 = vmatprep.subr.bf16.mxu0 %v3481_v1 }
0x1182   : > { %3008 = vmatpush3.bf16.msra.mxu0 %v3223_v4 }
0x1183   : > { %3009 = vmatprep.subr.bf16.mxu0 %v3481_v1 }
0x1186   : > { %3010 = vmatpush3.bf16.msra.mxu0 %v3224_v5 }
0x1187   : > { %3011 = vmatprep.subr.bf16.mxu0 %v3481_v1 }
0x118a   : > { %3012 = vmatpush3.bf16.msra.mxu0 %v3225_v21 }
0x118b   : > { %3013 = vmatprep.subr.bf16.mxu0 %v3481_v1 }
0x118e   : > { %3014 = vmatpush3.bf16.msra.mxu0 %v3226_v22 }
0x1244   : > { %v2114_v37 = vpop.f32.mrb[16].mxu0 }
0x1245   : > { %v2115_v35 = vadd.f32 %v2680_v51, %v2114_v37  ;;  %v2977_v52 = vpop.f32.mrb[17].mxu0  ;;  %v2716_v37 = vld [vmem:[%s4168_s28 + $0x1] ss:$0 sm:$0xff] }
0x1246   : > { %v2117_v53 = vpop.f32.mrb[18].mxu0 }
0x1247   : > { %v2120_v11 = vadd.f32 %v2115_v35, %v3953_v32  ;;  %v2978_v49 = vpop.f32.mrb[19].mxu0  ;;  %v3217_v32 = vld [vmem:[#allocation9 + $0x70] sm:$0xff]  }
0x1248   : > { %2992 = vmatpush3.bf16.msra.mxu1 %v3217_v32 }
0x1249   : > { %2125 = vadd.xlane.f32.xlu1 %v2120_v11  ;;  %v2128_v54 = vmul.f32 %v2120_v11, %v2120_v11  ;;  %2993 = vmatprep.subr.bf16.mxu1 %v3481_v1 }
0x124b   : > { %2129 = vadd.xlane.f32.xlu0 %v2128_v54 }
0x124c   : > { %2994 = vmatpush3.bf16.msra.mxu1 %v3218_v61  ;;  %v2717_v61 = vld [vmem:[%s4169_s19] ss:$0 sm:$0xff]  ;;  %s3401_s19 = scalar_lea.vmem %s3400_s26, 256 }
0x124d   : > { %p3403_p11 = scmp.lt.s32.totalorder %s3401_s19, %s3395_s13 }
0x124f   : > { %p3404_p12 = por %p3403_p11, %p3402_p1 }
0x1251   : > { %p3405_p13 = pnand %p3404_p12, %p3398_p10 }
0x12d6   : > { %v2126_v6 = vpop.xlane.xlu1 %2125 }
0x12d7   : > { %v2127_v7 = vmul.f32 0.03125, %v2126_v6 }
0x12d8   : > { %v2130_v8 = vpop.xlane.xlu0 %2129 }
0x12d9   : > { %v2132_v9 = vmul.f32 %v2127_v7, %v2127_v7  ;;  %v2131_v10 = vmul.f32 0.03125, %v2130_v8  ;;  %v2134_v13 = vsub.f32 %v2120_v11, %v2127_v7 }
0x12db   : > { %v2133_v30 = vsub.f32 %v2131_v10, %v2132_v9 }
0x12dd   : > { %v2135_v12 = vadd.f32 1e-05, %v2133_v30 }
0x12df   : > { %3247 = vrsqrt.f32 %v2135_v12 }
0x12e9   : > { %v3248_v14 = vpop.eup %3247 }
0x12ea   : > { %v2137_v16 = vmul.f32 %v3248_v14, %v2134_v13 }
0x12ec   : > { %v2144_v18 = vmul.f32 %v2691_v15, %v2137_v16 }
0x12ee   : > { %v2151_v19 = vadd.f32 %v2692_v17, %v2144_v18 }
0x12f0   : > { %v2152_v20 = vpack.c.bf16 %v2151_v19, %v2151_v19 }
0x12f2   : > { %2996 = vmatmul.mubr.bf16.vlgmr.msra.gmra.mrb[44].mxu1 %v2152_v20 }
0x13c5   : > { %v2260_v24 = vpop.f32.mrb[44].mxu1 }
0x13c6   : > { %v2261_v25 = vadd.f32 %v2694_v23, %v2260_v24  ;;  %v2997_v26 = vpop.f32.mrb[45].mxu1 }
0x13c7   : > { %v2263_v27 = vpop.f32.mrb[46].mxu1 }
0x13c8   : > { %v2266_v59 = vmax.f32 %v2261_v25, 0.0  ;;  %v2998_v28 = vpop.f32.mrb[47].mxu1 }
0x13ca   : > { %v2267_v29 = vpack.c.bf16 %v2266_v59, %v2266_v59 }
0x13cc   : > { %3016 = vmatmul.mubr.bf16.vlgmr.msra.gmra.mrb[20].mxu0 %v2267_v29 }
0x149f   : > { %v2375_v33 = vpop.f32.mrb[20].mxu0 }
0x14a0   : > { %v2376_v1 = vadd.f32 %v2704_v31, %v2375_v33  ;;  %v3017_v34 = vpop.f32.mrb[21].mxu0 }
0x14a1   : > { %v2378_v36 = vpop.f32.mrb[22].mxu0 }
0x14a2   : > { %v2381_v38 = vadd.f32 %v2376_v1, %v2151_v19  ;;  %v3018_v39 = vpop.f32.mrb[23].mxu0 }
0x14a4   : > { %2386 = vadd.xlane.f32.xlu1 %v2381_v38  ;;  %v2389_v40 = vmul.f32 %v2381_v38, %v2381_v38 }
0x14a8   : > { %2390 = vadd.xlane.f32.xlu1 %v2389_v40 }
0x1531   : > { %v2387_v41 = vpop.xlane.xlu1 %2386 }
0x1532   : > { %v2388_v42 = vmul.f32 0.03125, %v2387_v41 }
0x1534   : > { %v2393_v44 = vmul.f32 %v2388_v42, %v2388_v42  ;;  %v2395_v47 = vsub.f32 %v2381_v38, %v2388_v42 }
0x1535   : > { %v2391_v43 = vpop.xlane.xlu1 %2390 }
0x1536   : > { %v2392_v45 = vmul.f32 0.03125, %v2391_v43 }
0x1538   : > { %v2394_v46 = vsub.f32 %v2392_v45, %v2393_v44 }
0x153a   : > { %v2396_v0 = vadd.f32 1e-05, %v2394_v46 }
0x153c   : > { %3249 = vrsqrt.f32 %v2396_v0 }
0x1546   : > { %v3250_v48 = vpop.eup %3249 }
0x1547   : > { %v2398_v51 = vmul.f32 %v3250_v48, %v2395_v47 }
0x1549   : > { %v2405_v35 = vmul.f32 %v2715_v50, %v2398_v51 }
0x154b   : > { %v2412_v52 = vadd.f32 %v2716_v37, %v2405_v35 }
0x154d   : > { %2415 = vadd.xlane.f32.xlu0 %v2412_v52  ;;  %v2418_v53 = vmul.f32 %v2412_v52, %v2412_v52 }
0x154f   : > { %2419 = vadd.xlane.f32.xlu1 %v2418_v53 }
0x15da   : > { %v2416_v11 = vpop.xlane.xlu0 %2415 }
0x15db   : > { %v2417_v49 = vmul.f32 0.03125, %v2416_v11 }
0x15dc   : > { %v2420_v54 = vpop.xlane.xlu1 %2419 }
0x15dd   : > { %v2422_v55 = vmul.f32 %v2417_v49, %v2417_v49  ;;  %v2421_v56 = vmul.f32 0.03125, %v2420_v54  ;;  %v2424_v60 = vsub.f32 %v2412_v52, %v2417_v49 }
0x15df   : > { %v2423_v57 = vsub.f32 %v2421_v56, %v2422_v55 }
0x15e1   : > { %v2425_v58 = vadd.f32 1e-05, %v2423_v57 }
0x15e3   : > { %3251 = vrsqrt.f32 %v2425_v58 }
0x15ed   : > { %v3252_v32 = vpop.eup %3251 }
0x15ee   : > { %v2427_v62 = vmul.f32 %v3252_v32, %v2424_v60 }
0x15f0   : > { %v2434_v2 = vmul.f32 %v2717_v61, %v2427_v62 }
0x15f2   : > { %v2441_v3 = vadd.f32 %v2718_v63, %v2434_v2 }
0x15f4   : > { %2442 = vst [vmem:[%s605_s2] sm:$0xff] %v2441_v3 }
0x15f5   : > { %3408 = shalt.err (!%p3405_p13)
}
0x15f6   : > { %s3409_s1 = scalar_lea.hbm %s4059_s6, 128  ;;  %s3413_s17 = scalar_lea.hbm %s4171_s5, 256 }
0x15f7   : > { %p3410_p3 = scmp.ne.s32.totalorder %s4059_s6, %s3409_s1  ;;  %p3414_p4 = scmp.lt.u32.totalorder %s4059_s6, %s4171_s5 }
0x15f8   : > { %p3415_p8 = scmp.lt.u32.totalorder %s3413_s17, %s3409_s1  ;;  %p3417_p0 = scmp.lt.u32.totalorder %s3409_s1, %s4059_s6 }
0x15f9   : > { %p3411_p7 = pnand %p3410_p3, %p4172_p2 }
0x15fa   : > { %p3416_p6 = por %p3415_p8, %p3414_p4 }
0x15fb   : > { %p3412_p9 = pneg %p3411_p7 }
0x15fc   : > { %p3418_p5 = por %p3417_p0, %p3416_p6 }
0x15fe   : > { %p3419_p10 = pnand %p3418_p5, %p3412_p9 }
0x1600   : > { %3422 = shalt.err (!%p3419_p10)
}
0x1601   : > { %3037 = dma.vmem_to_hbm [thread:$0]  (%p4172_p2), %s4061_s0, 128, %s4059_s6, %s2444_s9  }
0x1602 PF: > { %s2469_s18 = sand.u32 1, %s3457_s21   ;;  %p4173_p1 = scmp.ne.s32.totalorder %s4154_s30, 0 }
0x1603   : > { %p4174_p11 = scmp.ge.s32.totalorder %s3469_s24, 2  ;;  %s2470_s2 = scalar_lea.sflag [#allocation5], %s2469_s18 }
0x1605   : > { %p3057_p12 = pnand %p4174_p11, %p4173_p1 }
0x1607   : > { %3452 = dma.done.wait (!%p3057_p12), %s2470_s2, 128  }
0x1608   : > { %3454 = vsyncadd (!%p3057_p12), %s2470_s2, 4294967168  ;;  %p31_p13 = scmp.ge.s32.totalorder %s3716_s29, 4   ;;  %s4175_s21 = smov %s3461_s22 }
0x1609   : > { %s4176_s22 = smov %s3465_s23  ;;  %s4177_s23 = smov %s3727_s20 }
0x160a   : > { %s4178_s24 = smov %s3716_s29  ;;  %33 = sbr.rel (!%p31_p13) target bundleno = 22 (0x16), region = 160 }
0x1611   :  { %2475 = vsyncpa [#allocation4], 1 }
0x1612   :  { %2477 = vsyncpa [#allocation4 + $0x1], 1 }
0x1613   :  { %2478 = vsyncpa [#allocation7], 1 }
0x1614   :  { %2479 = vsyncpa [#allocation10], 1 }
0x1615   :  { %2480 = vsyncpa [#allocation5], 1 }
0x1616   :  { %2482 = vsyncpa [#allocation5 + $0x1], 1 }

</bundles_post_ra>
